<compile_context>
chip_gen: v6e
topology: v6e:2x2x1
jax: 0.10.0
libtpu: 0.0.40
codegen_flags: <defaults>
</compile_context>

<pallas_src>
import functools
import math

import jax
import jax.numpy as jnp
from jax import lax
from jax.experimental import pallas as pl
from jax.experimental.pallas import tpu as pltpu

NEG_INF = -1e9  # masks padded label lanes out of the softmax


# --------------------------------------------------------------------------
# Pallas kernel: full autoregressive greedy decode
# --------------------------------------------------------------------------
def speller_kernel(feats_ref,
                   w_tok_ref, w_ctx_ref, w_hh_ref, b_rnn_ref,
                   phi_w_ref, phi_b_ref, psi_w_ref, psi_b_ref,
                   fc_dec_ref, fc_ctx_ref, fc_b_ref,
                   logp_ref,
                   *, max_step, sos_index):
    """Shapes (Lp = num_labels lane-padded to a multiple of 128):

      feats_ref : (B, T2, S) f32      listener features
      w_tok_ref : (Lp, 4S)  bf16      rnn W_ih, token (one-hot) block
      w_ctx_ref : (S, 4S)   bf16      rnn W_ih, context block
      w_hh_ref  : (S, 4S)   bf16      rnn W_hh
      b_rnn_ref : (1, 4S)   f32       b_ih + b_hh
      phi_w_ref : (S, M) bf16 ; phi_b_ref : (1, M) f32
      psi_w_ref : (S, M) bf16 ; psi_b_ref : (1, M) f32
      fc_dec_ref: (S, Lp) bf16        fc_out, decoder-output block
      fc_ctx_ref: (S, Lp) bf16        fc_out, context block
      fc_b_ref  : (1, Lp) f32         padding lanes hold NEG_INF
      logp_ref  : (max_step, B, Lp) f32   step-major output
    """
    B, T2, S = feats_ref.shape
    Lp = fc_b_ref.shape[1]
    f32, bf16 = jnp.float32, jnp.bfloat16

    feats = feats_ref[...]
    feats_bf = feats.astype(bf16)
    w_tok = w_tok_ref[...]
    w_ctx = w_ctx_ref[...]
    w_hh = w_hh_ref[...]
    b_rnn = b_rnn_ref[...]
    phi_w = phi_w_ref[...]
    phi_b = phi_b_ref[...]
    psi_w = psi_w_ref[...]
    psi_b = psi_b_ref[...]
    fc_dec = fc_dec_ref[...]
    fc_ctx = fc_ctx_ref[...]
    fc_b = fc_b_ref[...]

    # comp_listener_feat = relu(psi(listener_feats)) — one big MXU matmul,
    # hoisted out of the decode loop.
    comp_listener = jax.nn.relu(
        jnp.dot(feats_bf.reshape(B * T2, S), psi_w,
                preferred_element_type=f32) + psi_b
    ).reshape(B, T2, -1).astype(bf16)                          # (B, T2, M)

    # hoisted broadcast (JAX does not CSE broadcast_in_dim inside loops)
    lab_iota = lax.broadcasted_iota(jnp.int32, (B, Lp), 1)

    # initial carry: zero h/c, one-hot <sos>, context = feats[:, 0, :]
    h0 = jnp.zeros((B, S), f32)
    c0 = jnp.zeros((B, S), f32)
    tok0 = (lab_iota == sos_index).astype(f32)
    ctx0 = feats[:, 0, :]

    def body(step, carry):
        h, c, tok, ctx = carry

        # ---- decoder LSTM cell (split-weight matmuls, no lane concat) ----
        gates = (jnp.dot(tok.astype(bf16), w_tok, preferred_element_type=f32)
                 + jnp.dot(ctx.astype(bf16), w_ctx, preferred_element_type=f32)
                 + jnp.dot(h.astype(bf16), w_hh, preferred_element_type=f32)
                 + b_rnn)                                       # (B, 4S)
        i = jax.nn.sigmoid(gates[:, 0 * S:1 * S])
        f = jax.nn.sigmoid(gates[:, 1 * S:2 * S])
        g = jnp.tanh(gates[:, 2 * S:3 * S])
        o = jax.nn.sigmoid(gates[:, 3 * S:4 * S])
        c_new = f * c + i * g
        h_new = o * jnp.tanh(c_new)                             # (B, S)

        # ---- MLP attention (all matmuls on the MXU) ----
        comp_dec = jax.nn.relu(
            jnp.dot(h_new.astype(bf16), phi_w, preferred_element_type=f32)
            + phi_b)                                            # (B, M)
        energy = jnp.einsum('bqm,btm->bqt',
                            comp_dec[:, None, :].astype(bf16), comp_listener,
                            preferred_element_type=f32)[:, 0, :]  # (B, T2)
        e_max = jnp.max(energy, axis=-1, keepdims=True)
        e = jnp.exp(energy - e_max)
        att = e * pl.reciprocal(jnp.sum(e, axis=-1, keepdims=True),
                                approx=True)                    # (B, T2)
        context = jnp.einsum('bqt,bts->bqs',
                             att[:, None, :].astype(bf16), feats_bf,
                             preferred_element_type=f32)[:, 0, :]  # (B, S)

        # ---- output projection + log-softmax ----
        logits = (jnp.dot(h_new.astype(bf16), fc_dec,
                          preferred_element_type=f32)
                  + jnp.dot(context.astype(bf16), fc_ctx,
                            preferred_element_type=f32)
                  + fc_b)                                       # (B, Lp)
        l_max = jnp.max(logits, axis=-1, keepdims=True)
        lse = l_max + jnp.log(jnp.sum(jnp.exp(logits - l_max),
                                      axis=-1, keepdims=True))
        log_probs = logits - lse

        # lane-dense, leading-axis store (step-major output)
        logp_ref[pl.ds(step, 1), :, :] = log_probs[None]

        # ---- greedy feedback: one-hot(argmax), first-index tie break ----
        is_max = log_probs == jnp.max(log_probs, axis=-1, keepdims=True)
        idx = jnp.min(jnp.where(is_max, lab_iota, Lp), axis=-1, keepdims=True)
        tok_new = (lab_iota == idx).astype(f32)
        return h_new, c_new, tok_new, context

    lax.fori_loop(0, max_step, body, (h0, c0, tok0, ctx0))


# --------------------------------------------------------------------------
# Wrapper
# --------------------------------------------------------------------------
def speller_forward(ops, listener_feats, num_labels, label_maxlen,
                    sos_index=0):
    B, T2, S = listener_feats.shape
    Lp = ops['fc_b'].shape[1]
    vmem = pl.BlockSpec(memory_space=pltpu.MemorySpace.VMEM)
    kernel = functools.partial(speller_kernel, max_step=label_maxlen,
                               sos_index=sos_index)
    out = pl.pallas_call(
        kernel,
        out_shape=jax.ShapeDtypeStruct((label_maxlen, B, Lp), jnp.float32),
        in_specs=[vmem] * 12,
        out_specs=vmem,
    )(listener_feats,
      ops['w_tok'], ops['w_ctx'], ops['w_hh'], ops['b_rnn'],
      ops['phi_w'], ops['phi_b'], ops['psi_w'], ops['psi_b'],
      ops['fc_dec'], ops['fc_ctx'], ops['fc_b'])
    # (max_step, B, Lp)  ->  (B, max_step, num_labels)
    return jnp.transpose(out, (1, 0, 2))[:, :, :num_labels]


# --------------------------------------------------------------------------
# Parameter init (PyTorch default uniform init, PyTorch tensor layouts)
# --------------------------------------------------------------------------
def _uniform(key, shape, k):
    return jax.random.uniform(key, shape, jnp.float32, -k, k)


def init_speller_params(key, num_labels, listener_hidden_dim, mlp_hidden_dim):
    S = 2 * listener_hidden_dim          # speller_hidden_dim
    M = mlp_hidden_dim
    L = num_labels
    ks = jax.random.split(key, 10)
    k_rnn = 1.0 / math.sqrt(S)
    p = {
        'rnn_w_ih': _uniform(ks[0], (4 * S, L + S), k_rnn),
        'rnn_w_hh': _uniform(ks[1], (4 * S, S), k_rnn),
        'rnn_b_ih': _uniform(ks[2], (4 * S,), k_rnn),
        'rnn_b_hh': _uniform(ks[3], (4 * S,), k_rnn),
    }
    k_lin = 1.0 / math.sqrt(S)
    p['phi_w'] = _uniform(ks[4], (M, S), k_lin)
    p['phi_b'] = _uniform(ks[5], (M,), k_lin)
    p['psi_w'] = _uniform(ks[6], (M, S), k_lin)
    p['psi_b'] = _uniform(ks[7], (M,), k_lin)
    k_fc = 1.0 / math.sqrt(2 * S)
    p['fc_w'] = _uniform(ks[8], (L, 2 * S), k_fc)
    p['fc_b'] = _uniform(ks[9], (L,), k_fc)
    return p


def _pad_axis(x, axis, target):
    pad = target - x.shape[axis]
    if pad == 0:
        return x
    widths = [(0, 0)] * x.ndim
    widths[axis] = (0, pad)
    return jnp.pad(x, widths)


def prepare_speller_operands(p, num_labels):
    """Split / transpose / lane-pad / bf16-cast weights for the kernel."""
    L = num_labels
    S = p['rnn_w_hh'].shape[1]
    Lp = ((L + 127) // 128) * 128
    bf16 = jnp.bfloat16

    w_ih = p['rnn_w_ih']                         # (4S, L+S) acts on [tok; ctx]
    w_tok = _pad_axis(w_ih[:, :L].T, 0, Lp).astype(bf16)        # (Lp, 4S)
    w_ctx = w_ih[:, L:].T.astype(bf16)                          # (S, 4S)
    w_hh = p['rnn_w_hh'].T.astype(bf16)                         # (S, 4S)
    b_rnn = (p['rnn_b_ih'] + p['rnn_b_hh']).reshape(1, 4 * S)

    fc_w = p['fc_w']                             # (L, 2S) acts on [dec; ctx]
    fc_dec = _pad_axis(fc_w[:, :S].T, 1, Lp).astype(bf16)       # (S, Lp)
    fc_ctx = _pad_axis(fc_w[:, S:].T, 1, Lp).astype(bf16)       # (S, Lp)
    fc_b = jnp.full((1, Lp), NEG_INF, jnp.float32)
    fc_b = fc_b.at[0, :L].set(p['fc_b'])

    return dict(
        w_tok=w_tok, w_ctx=w_ctx, w_hh=w_hh, b_rnn=b_rnn,
        phi_w=p['phi_w'].T.astype(bf16), phi_b=p['phi_b'].reshape(1, -1),
        psi_w=p['psi_w'].T.astype(bf16), psi_b=p['psi_b'].reshape(1, -1),
        fc_dec=fc_dec, fc_ctx=fc_ctx, fc_b=fc_b,
    )


# --------------------------------------------------------------------------
if __name__ == "__main__":
    B = 2
    T2 = 16                     # listener output timesteps
    listener_hidden_dim = 64    # -> speller_hidden_dim S = 128 (lane aligned)
    mlp_hidden_dim = 128
    num_labels = 16
    label_maxlen = 8
    sos_index = 0

    key = jax.random.PRNGKey(0)
    k_feat, k_par = jax.random.split(key)
    S = 2 * listener_hidden_dim
    listener_feats = jax.random.normal(k_feat, (B, T2, S), jnp.float32)

    raw = init_speller_params(k_par, num_labels, listener_hidden_dim,
                              mlp_hidden_dim)
    ops = prepare_speller_operands(raw, num_labels)

    log_probs = speller_forward(ops, listener_feats, num_labels,
                                label_maxlen, sos_index)
    jax.block_until_ready(log_probs)

    assert log_probs.shape == (B, label_maxlen, num_labels), log_probs.shape
    assert bool(jnp.all(jnp.isfinite(log_probs)))
    # rows of exp(log_probs) must sum to 1 (log_softmax check)
    assert bool(jnp.allclose(jnp.exp(log_probs).sum(-1), 1.0, atol=1e-3))
    print("KERNEL_OK")
</pallas_src>

<mosaic_0001>
module attributes {stable_mosaic.version = 11 : i64} {
  func.func @speller_kernel(%arg0: memref<2x16x128xf32, #tpu.memory_space<vmem>>, %arg1: memref<128x512xbf16, #tpu.memory_space<vmem>>, %arg2: memref<128x512xbf16, #tpu.memory_space<vmem>>, %arg3: memref<128x512xbf16, #tpu.memory_space<vmem>>, %arg4: memref<1x512xf32, #tpu.memory_space<vmem>>, %arg5: memref<128x128xbf16, #tpu.memory_space<vmem>>, %arg6: memref<1x128xf32, #tpu.memory_space<vmem>>, %arg7: memref<128x128xbf16, #tpu.memory_space<vmem>>, %arg8: memref<1x128xf32, #tpu.memory_space<vmem>>, %arg9: memref<128x128xbf16, #tpu.memory_space<vmem>>, %arg10: memref<128x128xbf16, #tpu.memory_space<vmem>>, %arg11: memref<1x128xf32, #tpu.memory_space<vmem>>, %arg12: memref<8x2x128xf32, #tpu.memory_space<vmem>>) attributes {dimension_semantics = [], scalar_prefetch = 0 : i64, scratch_operands = 0 : i64, tpu.core_type = #tpu.core_type<tc>} {
    %c0 = arith.constant 0 : index
    %c0_0 = arith.constant 0 : index
    %c0_1 = arith.constant 0 : index
    %0 = vector.load %arg0[%c0, %c0_0, %c0_1] : memref<2x16x128xf32, #tpu.memory_space<vmem>>, vector<2x16x128xf32>
    %1 = arith.truncf %0 : vector<2x16x128xf32> to vector<2x16x128xbf16>
    %c0_2 = arith.constant 0 : index
    %c0_3 = arith.constant 0 : index
    %2 = vector.load %arg1[%c0_2, %c0_3] : memref<128x512xbf16, #tpu.memory_space<vmem>>, vector<128x512xbf16>
    %c0_4 = arith.constant 0 : index
    %c0_5 = arith.constant 0 : index
    %3 = vector.load %arg2[%c0_4, %c0_5] : memref<128x512xbf16, #tpu.memory_space<vmem>>, vector<128x512xbf16>
    %c0_6 = arith.constant 0 : index
    %c0_7 = arith.constant 0 : index
    %4 = vector.load %arg3[%c0_6, %c0_7] : memref<128x512xbf16, #tpu.memory_space<vmem>>, vector<128x512xbf16>
    %c0_8 = arith.constant 0 : index
    %c0_9 = arith.constant 0 : index
    %5 = vector.load %arg4[%c0_8, %c0_9] : memref<1x512xf32, #tpu.memory_space<vmem>>, vector<1x512xf32>
    %c0_10 = arith.constant 0 : index
    %c0_11 = arith.constant 0 : index
    %6 = vector.load %arg5[%c0_10, %c0_11] : memref<128x128xbf16, #tpu.memory_space<vmem>>, vector<128x128xbf16>
    %c0_12 = arith.constant 0 : index
    %c0_13 = arith.constant 0 : index
    %7 = vector.load %arg6[%c0_12, %c0_13] : memref<1x128xf32, #tpu.memory_space<vmem>>, vector<1x128xf32>
    %c0_14 = arith.constant 0 : index
    %c0_15 = arith.constant 0 : index
    %8 = vector.load %arg7[%c0_14, %c0_15] : memref<128x128xbf16, #tpu.memory_space<vmem>>, vector<128x128xbf16>
    %c0_16 = arith.constant 0 : index
    %c0_17 = arith.constant 0 : index
    %9 = vector.load %arg8[%c0_16, %c0_17] : memref<1x128xf32, #tpu.memory_space<vmem>>, vector<1x128xf32>
    %c0_18 = arith.constant 0 : index
    %c0_19 = arith.constant 0 : index
    %10 = vector.load %arg9[%c0_18, %c0_19] : memref<128x128xbf16, #tpu.memory_space<vmem>>, vector<128x128xbf16>
    %c0_20 = arith.constant 0 : index
    %c0_21 = arith.constant 0 : index
    %11 = vector.load %arg10[%c0_20, %c0_21] : memref<128x128xbf16, #tpu.memory_space<vmem>>, vector<128x128xbf16>
    %c0_22 = arith.constant 0 : index
    %c0_23 = arith.constant 0 : index
    %12 = vector.load %arg11[%c0_22, %c0_23] : memref<1x128xf32, #tpu.memory_space<vmem>>, vector<1x128xf32>
    %13 = vector.shape_cast %1 : vector<2x16x128xbf16> to vector<32x128xbf16>
    %cst = arith.constant dense<0.000000e+00> : vector<32x128xf32>
    %14 = tpu.matmul %13, %8, %cst {dimension_numbers = #tpu.dot_dimension_numbers<[1], [0], [0], [1], [0, 0, 1, 1], [], []>} : vector<32x128xbf16>, vector<128x128xbf16>, vector<32x128xf32> -> vector<32x128xf32>
    %15 = vector.broadcast %9 : vector<1x128xf32> to vector<32x128xf32>
    %16 = arith.addf %14, %15 : vector<32x128xf32>
    %cst_24 = arith.constant 0.000000e+00 : f32
    %17 = vector.broadcast %cst_24 : f32 to vector<32x128xf32>
    %18 = arith.maximumf %16, %17 : vector<32x128xf32>
    %19 = vector.shape_cast %18 : vector<32x128xf32> to vector<2x16x128xf32>
    %20 = arith.truncf %19 : vector<2x16x128xf32> to vector<2x16x128xbf16>
    %21 = tpu.iota {dimensions = array<i32: 1>} : vector<2x128xi32>
    %cst_25 = arith.constant 0.000000e+00 : f32
    %22 = vector.broadcast %cst_25 : f32 to vector<2x128xf32>
    %cst_26 = arith.constant 0.000000e+00 : f32
    %23 = vector.broadcast %cst_26 : f32 to vector<2x128xf32>
    %c0_i32 = arith.constant 0 : i32
    %24 = vector.broadcast %c0_i32 : i32 to vector<2x128xi32>
    %25 = arith.cmpi eq, %21, %24 : vector<2x128xi32>
    %26 = arith.extui %25 : vector<2x128xi1> to vector<2x128xi32>
    %27 = arith.sitofp %26 : vector<2x128xi32> to vector<2x128xf32>
    %28 = vector.extract_strided_slice %0 {offsets = [0, 0, 0], sizes = [2, 1, 128], strides = [1, 1, 1]} : vector<2x16x128xf32> to vector<2x1x128xf32>
    %29 = vector.shape_cast %28 : vector<2x1x128xf32> to vector<2x128xf32>
    %c0_i32_27 = arith.constant 0 : i32
    %c8_i32 = arith.constant 8 : i32
    %30 = arith.addi %c0_i32_27, %c8_i32 : i32
    %c1_i32 = arith.constant 1 : i32
    %31:4 = scf.for %arg13 = %c0_i32_27 to %30 step %c1_i32 iter_args(%arg14 = %22, %arg15 = %23, %arg16 = %27, %arg17 = %29) -> (vector<2x128xf32>, vector<2x128xf32>, vector<2x128xf32>, vector<2x128xf32>)  : i32 {
      %32 = arith.truncf %arg16 : vector<2x128xf32> to vector<2x128xbf16>
      %cst_29 = arith.constant dense<0.000000e+00> : vector<2x512xf32>
      %33 = tpu.matmul %32, %2, %cst_29 {dimension_numbers = #tpu.dot_dimension_numbers<[1], [0], [0], [1], [0, 0, 1, 1], [], []>} : vector<2x128xbf16>, vector<128x512xbf16>, vector<2x512xf32> -> vector<2x512xf32>
      %34 = arith.truncf %arg17 : vector<2x128xf32> to vector<2x128xbf16>
      %cst_30 = arith.constant dense<0.000000e+00> : vector<2x512xf32>
      %35 = tpu.matmul %34, %3, %cst_30 {dimension_numbers = #tpu.dot_dimension_numbers<[1], [0], [0], [1], [0, 0, 1, 1], [], []>} : vector<2x128xbf16>, vector<128x512xbf16>, vector<2x512xf32> -> vector<2x512xf32>
      %36 = arith.addf %33, %35 : vector<2x512xf32>
      %37 = arith.truncf %arg14 : vector<2x128xf32> to vector<2x128xbf16>
      %cst_31 = arith.constant dense<0.000000e+00> : vector<2x512xf32>
      %38 = tpu.matmul %37, %4, %cst_31 {dimension_numbers = #tpu.dot_dimension_numbers<[1], [0], [0], [1], [0, 0, 1, 1], [], []>} : vector<2x128xbf16>, vector<128x512xbf16>, vector<2x512xf32> -> vector<2x512xf32>
      %39 = arith.addf %36, %38 : vector<2x512xf32>
      %40 = vector.broadcast %5 : vector<1x512xf32> to vector<2x512xf32>
      %41 = arith.addf %39, %40 : vector<2x512xf32>
      %42 = vector.extract_strided_slice %41 {offsets = [0, 0], sizes = [2, 128], strides = [1, 1]} : vector<2x512xf32> to vector<2x128xf32>
      %43 = arith.negf %42 : vector<2x128xf32>
      %44 = math.exp %43 : vector<2x128xf32>
      %cst_32 = arith.constant 1.000000e+00 : f32
      %45 = vector.broadcast %cst_32 : f32 to vector<2x128xf32>
      %46 = arith.addf %45, %44 : vector<2x128xf32>
      %47 = arith.divf %45, %46 : vector<2x128xf32>
      %48 = vector.extract_strided_slice %41 {offsets = [0, 128], sizes = [2, 128], strides = [1, 1]} : vector<2x512xf32> to vector<2x128xf32>
      %49 = arith.negf %48 : vector<2x128xf32>
      %50 = math.exp %49 : vector<2x128xf32>
      %cst_33 = arith.constant 1.000000e+00 : f32
      %51 = vector.broadcast %cst_33 : f32 to vector<2x128xf32>
      %52 = arith.addf %51, %50 : vector<2x128xf32>
      %53 = arith.divf %51, %52 : vector<2x128xf32>
      %54 = vector.extract_strided_slice %41 {offsets = [0, 256], sizes = [2, 128], strides = [1, 1]} : vector<2x512xf32> to vector<2x128xf32>
      %55 = math.tanh %54 : vector<2x128xf32>
      %56 = vector.extract_strided_slice %41 {offsets = [0, 384], sizes = [2, 128], strides = [1, 1]} : vector<2x512xf32> to vector<2x128xf32>
      %57 = arith.negf %56 : vector<2x128xf32>
      %58 = math.exp %57 : vector<2x128xf32>
      %cst_34 = arith.constant 1.000000e+00 : f32
      %59 = vector.broadcast %cst_34 : f32 to vector<2x128xf32>
      %60 = arith.addf %59, %58 : vector<2x128xf32>
      %61 = arith.divf %59, %60 : vector<2x128xf32>
      %62 = arith.mulf %53, %arg15 : vector<2x128xf32>
      %63 = arith.mulf %47, %55 : vector<2x128xf32>
      %64 = arith.addf %62, %63 : vector<2x128xf32>
      %65 = math.tanh %64 : vector<2x128xf32>
      %66 = arith.mulf %61, %65 : vector<2x128xf32>
      %67 = arith.truncf %66 : vector<2x128xf32> to vector<2x128xbf16>
      %cst_35 = arith.constant dense<0.000000e+00> : vector<2x128xf32>
      %68 = tpu.matmul %67, %6, %cst_35 {dimension_numbers = #tpu.dot_dimension_numbers<[1], [0], [0], [1], [0, 0, 1, 1], [], []>} : vector<2x128xbf16>, vector<128x128xbf16>, vector<2x128xf32> -> vector<2x128xf32>
      %69 = vector.broadcast %7 : vector<1x128xf32> to vector<2x128xf32>
      %70 = arith.addf %68, %69 : vector<2x128xf32>
      %cst_36 = arith.constant 0.000000e+00 : f32
      %71 = vector.broadcast %cst_36 : f32 to vector<2x128xf32>
      %72 = arith.maximumf %70, %71 : vector<2x128xf32>
      %73 = vector.shape_cast %72 : vector<2x128xf32> to vector<2x1x128xf32>
      %74 = arith.truncf %73 : vector<2x1x128xf32> to vector<2x1x128xbf16>
      "tpu.trace_start"() <{level = 10 : i32, message = "bqm,btm->bqt"}> : () -> ()
      %cst_37 = arith.constant dense<0.000000e+00> : vector<2x1x16xf32>
      %75 = tpu.matmul %74, %20, %cst_37 {dimension_numbers = #tpu.dot_dimension_numbers<[2], [2], [1], [1], [0, 0, 0, 1, 1, 1], [0], [0]>} : vector<2x1x128xbf16>, vector<2x16x128xbf16>, vector<2x1x16xf32> -> vector<2x1x16xf32>
      "tpu.trace_stop"() : () -> ()
      %76 = vector.shape_cast %75 : vector<2x1x16xf32> to vector<2x16xf32>
      %cst_38 = arith.constant dense<0xFF800000> : vector<2xf32>
      %77 = vector.multi_reduction <maximumf>, %76, %cst_38 [1] : vector<2x16xf32> to vector<2xf32>
      %78 = vector.shape_cast %77 : vector<2xf32> to vector<2x1xf32>
      %79 = vector.broadcast %78 : vector<2x1xf32> to vector<2x16xf32>
      %80 = arith.subf %76, %79 : vector<2x16xf32>
      %81 = math.exp %80 : vector<2x16xf32>
      %cst_39 = arith.constant dense<0.000000e+00> : vector<2xf32>
      %82 = vector.multi_reduction <add>, %81, %cst_39 [1] : vector<2x16xf32> to vector<2xf32>
      %83 = vector.shape_cast %82 : vector<2xf32> to vector<2x1xf32>
      %84 = tpu.reciprocal %83 {approx = true} : vector<2x1xf32> -> vector<2x1xf32>
      %85 = vector.broadcast %84 : vector<2x1xf32> to vector<2x16xf32>
      %86 = arith.mulf %81, %85 : vector<2x16xf32>
      %87 = vector.shape_cast %86 : vector<2x16xf32> to vector<2x1x16xf32>
      %88 = arith.truncf %87 : vector<2x1x16xf32> to vector<2x1x16xbf16>
      "tpu.trace_start"() <{level = 10 : i32, message = "bqt,bts->bqs"}> : () -> ()
      %cst_40 = arith.constant dense<0.000000e+00> : vector<2x1x128xf32>
      %89 = tpu.matmul %88, %1, %cst_40 {dimension_numbers = #tpu.dot_dimension_numbers<[2], [1], [1], [2], [0, 0, 0, 1, 1, 2], [0], [0]>} : vector<2x1x16xbf16>, vector<2x16x128xbf16>, vector<2x1x128xf32> -> vector<2x1x128xf32>
      "tpu.trace_stop"() : () -> ()
      %90 = vector.shape_cast %89 : vector<2x1x128xf32> to vector<2x128xf32>
      %91 = arith.truncf %66 : vector<2x128xf32> to vector<2x128xbf16>
      %cst_41 = arith.constant dense<0.000000e+00> : vector<2x128xf32>
      %92 = tpu.matmul %91, %10, %cst_41 {dimension_numbers = #tpu.dot_dimension_numbers<[1], [0], [0], [1], [0, 0, 1, 1], [], []>} : vector<2x128xbf16>, vector<128x128xbf16>, vector<2x128xf32> -> vector<2x128xf32>
      %93 = arith.truncf %90 : vector<2x128xf32> to vector<2x128xbf16>
      %cst_42 = arith.constant dense<0.000000e+00> : vector<2x128xf32>
      %94 = tpu.matmul %93, %11, %cst_42 {dimension_numbers = #tpu.dot_dimension_numbers<[1], [0], [0], [1], [0, 0, 1, 1], [], []>} : vector<2x128xbf16>, vector<128x128xbf16>, vector<2x128xf32> -> vector<2x128xf32>
      %95 = arith.addf %92, %94 : vector<2x128xf32>
      %96 = vector.broadcast %12 : vector<1x128xf32> to vector<2x128xf32>
      %97 = arith.addf %95, %96 : vector<2x128xf32>
      %cst_43 = arith.constant dense<0xFF800000> : vector<2xf32>
      %98 = vector.multi_reduction <maximumf>, %97, %cst_43 [1] : vector<2x128xf32> to vector<2xf32>
      %99 = vector.shape_cast %98 : vector<2xf32> to vector<2x1xf32>
      %100 = vector.broadcast %99 : vector<2x1xf32> to vector<2x128xf32>
      %101 = arith.subf %97, %100 : vector<2x128xf32>
      %102 = math.exp %101 : vector<2x128xf32>
      %cst_44 = arith.constant dense<0.000000e+00> : vector<2xf32>
      %103 = vector.multi_reduction <add>, %102, %cst_44 [1] : vector<2x128xf32> to vector<2xf32>
      %104 = vector.shape_cast %103 : vector<2xf32> to vector<2x1xf32>
      %105 = math.log %104 : vector<2x1xf32>
      %106 = arith.addf %99, %105 : vector<2x1xf32>
      %107 = vector.broadcast %106 : vector<2x1xf32> to vector<2x128xf32>
      %108 = arith.subf %97, %107 : vector<2x128xf32>
      %109 = vector.shape_cast %108 : vector<2x128xf32> to vector<1x2x128xf32>
      %110 = arith.index_cast %arg13 : i32 to index
      %c0_45 = arith.constant 0 : index
      %c0_46 = arith.constant 0 : index
      %111 = vector.load %arg12[%110, %c0_45, %c0_46] : memref<8x2x128xf32, #tpu.memory_space<vmem>>, vector<1x2x128xf32>
      tpu.vector_store %arg12[%110, %c0_45, %c0_46], %109 {strides = array<i32>} : memref<8x2x128xf32, #tpu.memory_space<vmem>>, vector<1x2x128xf32>,
      %cst_47 = arith.constant dense<0xFF800000> : vector<2xf32>
      %112 = vector.multi_reduction <maximumf>, %108, %cst_47 [1] : vector<2x128xf32> to vector<2xf32>
      %113 = vector.shape_cast %112 : vector<2xf32> to vector<2x1xf32>
      %114 = vector.broadcast %113 : vector<2x1xf32> to vector<2x128xf32>
      %115 = arith.cmpf oeq, %108, %114 : vector<2x128xf32>
      %c128_i32 = arith.constant 128 : i32
      %116 = vector.broadcast %c128_i32 : i32 to vector<2x128xi32>
      %117 = arith.select %115, %21, %116 : vector<2x128xi1>, vector<2x128xi32>
      %cst_48 = arith.constant dense<2147483647> : vector<2xi32>
      %118 = vector.multi_reduction <minsi>, %117, %cst_48 [1] : vector<2x128xi32> to vector<2xi32>
      %119 = vector.shape_cast %118 : vector<2xi32> to vector<2x1xi32>
      %120 = vector.broadcast %119 : vector<2x1xi32> to vector<2x128xi32>
      %121 = arith.cmpi eq, %21, %120 : vector<2x128xi32>
      %122 = arith.extui %121 : vector<2x128xi1> to vector<2x128xi32>
      %123 = arith.sitofp %122 : vector<2x128xi32> to vector<2x128xf32>
      scf.yield %66, %64, %123, %90 : vector<2x128xf32>, vector<2x128xf32>, vector<2x128xf32>, vector<2x128xf32>
    }
    %c8_i32_28 = arith.constant 8 : i32
    return
  }
}

</mosaic_0001>

<bundles_post_ra>
// kernel: tpu_custom_call.1
= control target key start
LH: loop header
LB: loop body
LE: loop exit
PB: predicated region body
PF: predicated region fallthrough
CT: control target
= control target key end

     0   :  { %17 = vsyncpa [#allocation3], 0  ;;  %s3319_s0 = inlined_call_operand.hbm [shape: f32[2,16,128], index: 0, kind: input, shape index: {}]   ;;  %s3320_s1 = inlined_call_operand.hbm [shape: bf16[128,512], index: 1, kind: input, shape index: {}]   ;;  %s3321_s2 = inlined_call_operand.hbm [shape: bf16[128,512], index: 2, kind: input, shape index: {}]   ;;  %s3322_s3 = inlined_call_operand.hbm [shape: bf16[128,512], index: 3, kind: input, shape index: {}]   ;;  %s3323_s4 = inlined_call_operand.vmem [shape: f32[1,512], index: 4, kind: input, shape index: {}]   ;;  %s3324_s5 = inlined_call_operand.hbm [shape: bf16[128,128], index: 5, kind: input, shape index: {}]   ;;  %s3325_s6 = inlined_call_operand.vmem [shape: f32[1,128], index: 6, kind: input, shape index: {}]   ;;  %s3326_s7 = inlined_call_operand.hbm [shape: bf16[128,128], index: 7, kind: input, shape index: {}]   ;;  %s3327_s8 = inlined_call_operand.vmem [shape: f32[1,128], index: 8, kind: input, shape index: {}]   ;;  %s3328_s9 = inlined_call_operand.hbm [shape: bf16[128,128], index: 9, kind: input, shape index: {}]   ;;  %s3329_s10 = inlined_call_operand.hbm [shape: bf16[128,128], index: 10, kind: input, shape index: {}]   ;;  %s3330_s11 = inlined_call_operand.vmem [shape: f32[1,128], index: 11, kind: input, shape index: {}]   ;;  %s3331_s12 = inlined_call_operand.hbm [shape: f32[8,2,128], index: 12, kind: output, shape index: {}]  }
   0x1   :  { %18 = vsyncpa [#allocation6], 0 }
   0x2   :  { %19 = vsyncpa [#allocation9], 0 }
   0x3   :  { %20 = vsyncpa [#allocation12], 0 }
   0x4   :  { %21 = vsyncpa [#allocation15], 0 }
   0x5   :  { %22 = vsyncpa [#allocation4], 0  ;;  %s2473_s21 = smov [#allocation5]  }
   0x6   :  { %s40_s22 = sshll.u32 %s2473_s21, 4  ;;  %s41_s22 = int_to_ptr.vmem [resolvable:$true] %s40_s22 }
   0x7   :  { %s2241_s23 = scalar_lea.vmem %s41_s22, 4096  ;;  %p2246_p1 = scmp.lt.s32.totalorder %s41_s22, %s41_s22 }
   0x8   :  { %p2242_p0 = scmp.ne.s32.totalorder %s41_s22, %s2241_s23  ;;  %p2247_p2 = scmp.lt.s32.totalorder %s2241_s23, %s2241_s23 }
   0xa   :  { %p2248_p3 = por %p2247_p2, %p2246_p1 }
   0xc   :  { %p2249_p4 = pnand %p2248_p3, %p2242_p0 }
   0xe   :  { %2252 = shalt.err (!%p2249_p4)
}
   0xf   :  { %s2474_s24 = smov 256   ;;  %s2475_s25 = smov 16  }
  0x10   :  { %46 = dma.hbm_to_vmem [thread:$0]  %s3320_s1, 4096, %s41_s22, [#allocation6], %s2474_s24, %s2474_s24, %s2475_s25  }
  0x11   :  { %s2476_s28 = smov [#allocation8]  }
  0x12   :  { %s64_s29 = sshll.u32 %s2476_s28, 4  ;;  %s65_s29 = int_to_ptr.vmem [resolvable:$true] %s64_s29 }
  0x13   :  { %s2261_s30 = scalar_lea.vmem %s65_s29, 4096  ;;  %p2266_p6 = scmp.lt.s32.totalorder %s65_s29, %s65_s29 }
  0x14   :  { %p2262_p5 = scmp.ne.s32.totalorder %s65_s29, %s2261_s30  ;;  %p2267_p7 = scmp.lt.s32.totalorder %s2261_s30, %s2261_s30 }
  0x16   :  { %p2268_p8 = por %p2267_p7, %p2266_p6 }
  0x18   :  { %p2269_p9 = pnand %p2268_p8, %p2262_p5 }
  0x1a   :  { %2272 = shalt.err (!%p2269_p9)
}
  0x1b   :  { %70 = dma.hbm_to_vmem [thread:$0]  %s3322_s3, 4096, %s65_s29, [#allocation9], %s2474_s24, %s2474_s24, %s2475_s25  }
  0x1c   :  { %s2477_s15 = smov [#allocation11]   ;;  %s2478_s1 = smov [#allocation2]  }
  0x1d   :  { %s92_s16 = sshll.u32 %s2477_s15, 4  ;;  %s28_s17 = sshll.u32 %s2478_s1, 4  ;;  %s93_s16 = int_to_ptr.vmem [resolvable:$true] %s92_s16  ;;  %s29_s17 = int_to_ptr.vmem [resolvable:$true] %s28_s17 }
  0x1e   :  { %s2281_s18 = scalar_lea.vmem %s93_s16, 1024  ;;  %p2286_p11 = scmp.lt.s32.totalorder %s93_s16, %s93_s16 }
  0x1f   :  { %p2282_p10 = scmp.ne.s32.totalorder %s93_s16, %s2281_s18  ;;  %p2287_p12 = scmp.lt.s32.totalorder %s2281_s18, %s2281_s18 }
  0x21   :  { %p2288_p13 = por %p2287_p12, %p2286_p11 }
  0x23   :  { %p2289_p0 = pnand %p2288_p13, %p2282_p10 }
  0x25   :  { %2292 = shalt.err (!%p2289_p0)
}
  0x26   :  { %s2479_s19 = smov 64   ;;  %s2480_s20 = smov 4  }
  0x27   :  { %98 = dma.hbm_to_vmem [thread:$0]  %s3326_s7, 1024, %s93_s16, [#allocation12], %s2479_s19, %s2479_s19, %s2480_s20  }
  0x28   :  { %s2301_s22 = scalar_lea.vmem %s29_s17, 512  ;;  %p2306_p2 = scmp.lt.s32.totalorder %s29_s17, %s29_s17 }
  0x29   :  { %p2302_p1 = scmp.ne.s32.totalorder %s29_s17, %s2301_s22  ;;  %p2307_p3 = scmp.lt.s32.totalorder %s2301_s22, %s2301_s22 }
  0x2b   :  { %p2308_p4 = por %p2307_p3, %p2306_p2 }
  0x2d   :  { %p2309_p5 = pnand %p2308_p4, %p2302_p1 }
  0x2f   :  { %2312 = shalt.err (!%p2309_p5)
}
  0x30   :  { %s2481_s23 = smov 128   ;;  %s2482_s26 = smov 8  }
  0x31   :  { %34 = dma.hbm_to_vmem [thread:$0]  %s3319_s0, 512, %s29_s17, [#allocation3], %s2481_s23, %s2481_s23, %s2482_s26  }
  0x32   :  { %s2483_s29 = smov [#allocation7]   ;;  %s2484_s13 = smov [#allocation10]  }
  0x33   :  { %s52_s30 = sshll.u32 %s2483_s29, 4  ;;  %s78_s14 = sshll.u32 %s2484_s13, 4  ;;  %s53_s30 = int_to_ptr.vmem [resolvable:$true] %s52_s30  ;;  %s79_s14 = int_to_ptr.vmem [resolvable:$true] %s78_s14 }
  0x34   :  { %s2321_s7 = scalar_lea.vmem %s53_s30, 4096  ;;  %p2326_p7 = scmp.lt.s32.totalorder %s53_s30, %s53_s30 }
  0x35   :  { %p2322_p6 = scmp.ne.s32.totalorder %s53_s30, %s2321_s7  ;;  %p2327_p8 = scmp.lt.s32.totalorder %s2321_s7, %s2321_s7 }
  0x37   :  { %p2328_p9 = por %p2327_p8, %p2326_p7 }
  0x39   :  { %p2329_p10 = pnand %p2328_p9, %p2322_p6 }
  0x3b   :  { %2332 = shalt.err (!%p2329_p10)
}
  0x3c   :  { %58 = dma.hbm_to_vmem [thread:$0]  %s3321_s2, 4096, %s53_s30, [#allocation6], %s2474_s24, %s2474_s24, %s2475_s25  }
  0x3d   :  { %s2341_s0 = scalar_lea.vmem %s79_s14, 1024  ;;  %p2346_p12 = scmp.lt.s32.totalorder %s79_s14, %s79_s14 }
  0x3e   :  { %p2342_p11 = scmp.ne.s32.totalorder %s79_s14, %s2341_s0  ;;  %p2347_p13 = scmp.lt.s32.totalorder %s2341_s0, %s2341_s0 }
  0x40   :  { %p2348_p0 = por %p2347_p13, %p2346_p12 }
  0x42   :  { %p2349_p1 = pnand %p2348_p0, %p2342_p11 }
  0x44   :  { %2352 = shalt.err (!%p2349_p1)
}
  0x45   :  { %84 = dma.hbm_to_vmem [thread:$0]  %s3324_s5, 1024, %s79_s14, [#allocation9], %s2479_s19, %s2479_s19, %s2480_s20  }
  0x46   :  { %s2485_s18 = smov [#allocation13]   ;;  %s2486_s3 = smov [#allocation14]  }
  0x47   :  { %s106_s21 = sshll.u32 %s2485_s18, 4  ;;  %s118_s22 = sshll.u32 %s2486_s3, 4  ;;  %s107_s21 = int_to_ptr.vmem [resolvable:$true] %s106_s21  ;;  %s119_s22 = int_to_ptr.vmem [resolvable:$true] %s118_s22 }
  0x48   :  { %s2361_s2 = scalar_lea.vmem %s107_s21, 1024  ;;  %p2366_p3 = scmp.lt.s32.totalorder %s107_s21, %s107_s21 }
  0x49   :  { %p2362_p2 = scmp.ne.s32.totalorder %s107_s21, %s2361_s2  ;;  %p2367_p4 = scmp.lt.s32.totalorder %s2361_s2, %s2361_s2 }
  0x4b   :  { %p2368_p5 = por %p2367_p4, %p2366_p3 }
  0x4d   :  { %p2369_p6 = pnand %p2368_p5, %p2362_p2 }
  0x4f   :  { %2372 = shalt.err (!%p2369_p6)
}
  0x50   :  { %112 = dma.hbm_to_vmem [thread:$0]  %s3328_s9, 1024, %s107_s21, [#allocation12], %s2479_s19, %s2479_s19, %s2480_s20  }
  0x51   :  { %s2381_s5 = scalar_lea.vmem %s119_s22, 1024  ;;  %p2386_p8 = scmp.lt.s32.totalorder %s119_s22, %s119_s22 }
  0x52   :  { %p2382_p7 = scmp.ne.s32.totalorder %s119_s22, %s2381_s5  ;;  %p2387_p9 = scmp.lt.s32.totalorder %s2381_s5, %s2381_s5 }
  0x54   :  { %p2388_p10 = por %p2387_p9, %p2386_p8 }
  0x56   :  { %p2389_p11 = pnand %p2388_p10, %p2382_p7 }
  0x58   :  { %2392 = shalt.err (!%p2389_p11)
}
  0x59   :  { %124 = dma.hbm_to_vmem [thread:$0]  %s3329_s10, 1024, %s119_s22, [#allocation15], %s2479_s19, %s2479_s19, %s2480_s20  }
  0x5a   :  { %2437 = dma.done.wait [#allocation3], 512  }
  0x5b   :  { %2438 = vsyncadd [#allocation3], 4294966784 }
  0x5c   :  { %2439 = dma.done.wait [#allocation6], 8192  }
  0x5d   :  { %2440 = vsyncadd [#allocation6], 4294959104 }
  0x5e   :  { %2441 = dma.done.wait [#allocation9], 5120  }
  0x5f   :  { %2442 = vsyncadd [#allocation9], 4294962176 }
  0x60   :  { %2443 = dma.done.wait [#allocation12], 2048  }
  0x61   :  { %2444 = vsyncadd [#allocation12], 4294965248 }
  0x62   :  { %2445 = dma.done.wait [#allocation15], 1024  }
  0x63   :  { %2446 = vsyncadd [#allocation15], 4294966272  ;;  %v2605_v0 = vld [vmem:[#allocation5] sm:$0xff]  ;;  %v2607_v1 = vld [vmem:[#allocation5 + $0x8] sm:$0xff] }
  0x64   :  { %3456 = vst [vmem:[#allocation23_spill] sm:$0xff] %v2605_v0  ;;  %3457 = vst [vmem:[#allocation24_spill] sm:$0xff] %v2607_v1  ;;  %v2609_v2 = vld [vmem:[#allocation5 + $0x10] sm:$0xff]  ;;  %v2611_v3 = vld [vmem:[#allocation5 + $0x18] sm:$0xff] }
  0x65   :  { %3458 = vst [vmem:[#allocation25_spill] sm:$0xff] %v2609_v2  ;;  %3459 = vst [vmem:[#allocation26_spill] sm:$0xff] %v2611_v3  ;;  %v2613_v4 = vld [vmem:[#allocation5 + $0x20] sm:$0xff]  ;;  %v2615_v5 = vld [vmem:[#allocation5 + $0x28] sm:$0xff] }
  0x66   :  { %3460 = vst [vmem:[#allocation27_spill] sm:$0xff] %v2613_v4  ;;  %3461 = vst [vmem:[#allocation28_spill] sm:$0xff] %v2615_v5  ;;  %v2617_v6 = vld [vmem:[#allocation5 + $0x30] sm:$0xff]  ;;  %v2619_v7 = vld [vmem:[#allocation5 + $0x38] sm:$0xff] }
  0x67   :  { %3462 = vst [vmem:[#allocation29_spill] sm:$0xff] %v2617_v6  ;;  %3463 = vst [vmem:[#allocation30_spill] sm:$0xff] %v2619_v7  ;;  %v2621_v8 = vld [vmem:[#allocation5 + $0x40] sm:$0xff]  ;;  %v2623_v9 = vld [vmem:[#allocation5 + $0x48] sm:$0xff] }
  0x68   :  { %3464 = vst [vmem:[#allocation31_spill] sm:$0xff] %v2621_v8  ;;  %3465 = vst [vmem:[#allocation32_spill] sm:$0xff] %v2623_v9  ;;  %v2625_v10 = vld [vmem:[#allocation5 + $0x50] sm:$0xff]  ;;  %v2627_v11 = vld [vmem:[#allocation5 + $0x58] sm:$0xff] }
  0x69   :  { %3466 = vst [vmem:[#allocation33_spill] sm:$0xff] %v2625_v10  ;;  %3467 = vst [vmem:[#allocation34_spill] sm:$0xff] %v2627_v11  ;;  %v2629_v12 = vld [vmem:[#allocation5 + $0x60] sm:$0xff]  ;;  %v2631_v13 = vld [vmem:[#allocation5 + $0x68] sm:$0xff] }
  0x6a   :  { %3468 = vst [vmem:[#allocation35_spill] sm:$0xff] %v2629_v12  ;;  %3469 = vst [vmem:[#allocation36_spill] sm:$0xff] %v2631_v13  ;;  %v2633_v14 = vld [vmem:[#allocation5 + $0x70] sm:$0xff]  ;;  %v2635_v15 = vld [vmem:[#allocation5 + $0x78] sm:$0xff] }
  0x6b   :  { %3470 = vst [vmem:[#allocation37_spill] sm:$0xff] %v2633_v14  ;;  %3471 = vst [vmem:[#allocation38_spill] sm:$0xff] %v2635_v15  ;;  %v2637_v16 = vld [vmem:[#allocation5 + $0x80] sm:$0xff]  ;;  %v2639_v17 = vld [vmem:[#allocation5 + $0x88] sm:$0xff] }
  0x6c   :  { %3472 = vst [vmem:[#allocation39_spill] sm:$0xff] %v2637_v16  ;;  %3473 = vst [vmem:[#allocation40_spill] sm:$0xff] %v2639_v17  ;;  %v2641_v18 = vld [vmem:[#allocation5 + $0x90] sm:$0xff]  ;;  %v2643_v19 = vld [vmem:[#allocation5 + $0x98] sm:$0xff] }
  0x6d   :  { %3474 = vst [vmem:[#allocation41_spill] sm:$0xff] %v2641_v18  ;;  %3475 = vst [vmem:[#allocation42_spill] sm:$0xff] %v2643_v19  ;;  %v2645_v20 = vld [vmem:[#allocation5 + $0xa0] sm:$0xff]  ;;  %v2647_v21 = vld [vmem:[#allocation5 + $0xa8] sm:$0xff] }
  0x6e   :  { %3476 = vst [vmem:[#allocation43_spill] sm:$0xff] %v2645_v20  ;;  %3477 = vst [vmem:[#allocation44_spill] sm:$0xff] %v2647_v21  ;;  %v2649_v22 = vld [vmem:[#allocation5 + $0xb0] sm:$0xff]  ;;  %v2651_v23 = vld [vmem:[#allocation5 + $0xb8] sm:$0xff] }
  0x6f   :  { %3478 = vst [vmem:[#allocation45_spill] sm:$0xff] %v2649_v22  ;;  %3479 = vst [vmem:[#allocation46_spill] sm:$0xff] %v2651_v23  ;;  %v2653_v24 = vld [vmem:[#allocation5 + $0xc0] sm:$0xff]  ;;  %v2655_v25 = vld [vmem:[#allocation5 + $0xc8] sm:$0xff] }
  0x70   :  { %3480 = vst [vmem:[#allocation47_spill] sm:$0xff] %v2653_v24  ;;  %3481 = vst [vmem:[#allocation48_spill] sm:$0xff] %v2655_v25  ;;  %v2657_v26 = vld [vmem:[#allocation5 + $0xd0] sm:$0xff]  ;;  %v2659_v27 = vld [vmem:[#allocation5 + $0xd8] sm:$0xff] }
  0x71   :  { %3482 = vst [vmem:[#allocation49_spill] sm:$0xff] %v2657_v26  ;;  %3483 = vst [vmem:[#allocation50_spill] sm:$0xff] %v2659_v27  ;;  %v2661_v28 = vld [vmem:[#allocation5 + $0xe0] sm:$0xff]  ;;  %v2663_v29 = vld [vmem:[#allocation5 + $0xe8] sm:$0xff] }
  0x72   :  { %3484 = vst [vmem:[#allocation51_spill] sm:$0xff] %v2661_v28  ;;  %3485 = vst [vmem:[#allocation52_spill] sm:$0xff] %v2663_v29  ;;  %v2665_v30 = vld [vmem:[#allocation5 + $0xf0] sm:$0xff]  ;;  %v2667_v31 = vld [vmem:[#allocation5 + $0xf8] sm:$0xff] }
  0x73   :  { %3486 = vst [vmem:[#allocation53_spill] sm:$0xff] %v2665_v30  ;;  %v2669_v32 = vld [vmem:[#allocation7] sm:$0xff]  ;;  %v2671_v33 = vld [vmem:[#allocation7 + $0x8] sm:$0xff]  ;;  %v2673_v34 = vld [vmem:[#allocation7 + $0x10] sm:$0xff] }
  0x74   :  { %v2675_v35 = vld [vmem:[#allocation7 + $0x18] sm:$0xff]  ;;  %v2677_v36 = vld [vmem:[#allocation7 + $0x20] sm:$0xff]  ;;  %v2679_v37 = vld [vmem:[#allocation7 + $0x28] sm:$0xff] }
  0x75   :  { %v2681_v38 = vld [vmem:[#allocation7 + $0x30] sm:$0xff]  ;;  %v2683_v39 = vld [vmem:[#allocation7 + $0x38] sm:$0xff]  ;;  %v2685_v40 = vld [vmem:[#allocation7 + $0x40] sm:$0xff] }
  0x76   :  { %v2687_v41 = vld [vmem:[#allocation7 + $0x48] sm:$0xff]  ;;  %v2689_v42 = vld [vmem:[#allocation7 + $0x50] sm:$0xff]  ;;  %v2691_v43 = vld [vmem:[#allocation7 + $0x58] sm:$0xff] }
  0x77   :  { %v2693_v44 = vld [vmem:[#allocation7 + $0x60] sm:$0xff]  ;;  %v2695_v45 = vld [vmem:[#allocation7 + $0x68] sm:$0xff]  ;;  %v2697_v46 = vld [vmem:[#allocation7 + $0x70] sm:$0xff] }
  0x78   :  { %v2699_v47 = vld [vmem:[#allocation7 + $0x78] sm:$0xff]  ;;  %v2701_v48 = vld [vmem:[#allocation7 + $0x80] sm:$0xff]  ;;  %v2703_v49 = vld [vmem:[#allocation7 + $0x88] sm:$0xff] }
  0x79   :  { %v2705_v50 = vld [vmem:[#allocation7 + $0x90] sm:$0xff]  ;;  %v2707_v51 = vld [vmem:[#allocation7 + $0x98] sm:$0xff]  ;;  %v2709_v52 = vld [vmem:[#allocation7 + $0xa0] sm:$0xff] }
  0x7a   :  { %v2711_v53 = vld [vmem:[#allocation7 + $0xa8] sm:$0xff]  ;;  %v2713_v54 = vld [vmem:[#allocation7 + $0xb0] sm:$0xff]  ;;  %v2715_v55 = vld [vmem:[#allocation7 + $0xb8] sm:$0xff] }
  0x7b   :  { %v2717_v56 = vld [vmem:[#allocation7 + $0xc0] sm:$0xff]  ;;  %v2719_v57 = vld [vmem:[#allocation7 + $0xc8] sm:$0xff]  ;;  %v2721_v58 = vld [vmem:[#allocation7 + $0xd0] sm:$0xff] }
  0x7c   :  { %v2723_v59 = vld [vmem:[#allocation7 + $0xd8] sm:$0xff]  ;;  %v2725_v60 = vld [vmem:[#allocation7 + $0xe0] sm:$0xff]  ;;  %v2727_v61 = vld [vmem:[#allocation7 + $0xe8] sm:$0xff] }
  0x7d   :  { %v2729_v62 = vld [vmem:[#allocation7 + $0xf0] sm:$0xff]  ;;  %v2731_v63 = vld [vmem:[#allocation7 + $0xf8] sm:$0xff]  ;;  %v2733_v1 = vld [vmem:[#allocation8] sm:$0xff] }
  0x7e   :  { %3487 = vst [vmem:[#allocation54_spill] sm:$0xff] %v2733_v1  ;;  %v2735_v3 = vld [vmem:[#allocation8 + $0x8] sm:$0xff]  ;;  %v2737_v0 = vld [vmem:[#allocation8 + $0x10] sm:$0xff]  ;;  %v2739_v2 = vld [vmem:[#allocation8 + $0x18] sm:$0xff] }
  0x7f   :  { %3488 = vst [vmem:[#allocation55_spill] sm:$0xff] %v2735_v3  ;;  %3489 = vst [vmem:[#allocation56_spill] sm:$0xff] %v2737_v0  ;;  %v2741_v5 = vld [vmem:[#allocation8 + $0x20] sm:$0xff]  ;;  %v2743_v7 = vld [vmem:[#allocation8 + $0x28] sm:$0xff] }
  0x80   :  { %3490 = vst [vmem:[#allocation57_spill] sm:$0xff] %v2739_v2  ;;  %3491 = vst [vmem:[#allocation58_spill] sm:$0xff] %v2741_v5  ;;  %v2745_v4 = vld [vmem:[#allocation8 + $0x30] sm:$0xff]  ;;  %v2747_v6 = vld [vmem:[#allocation8 + $0x38] sm:$0xff] }
  0x81   :  { %3492 = vst [vmem:[#allocation59_spill] sm:$0xff] %v2743_v7  ;;  %3493 = vst [vmem:[#allocation60_spill] sm:$0xff] %v2745_v4  ;;  %v2749_v9 = vld [vmem:[#allocation8 + $0x40] sm:$0xff]  ;;  %v2751_v11 = vld [vmem:[#allocation8 + $0x48] sm:$0xff] }
  0x82   :  { %3494 = vst [vmem:[#allocation61_spill] sm:$0xff] %v2747_v6  ;;  %3495 = vst [vmem:[#allocation62_spill] sm:$0xff] %v2749_v9  ;;  %v2753_v8 = vld [vmem:[#allocation8 + $0x50] sm:$0xff]  ;;  %v2755_v1 = vld [vmem:[#allocation8 + $0x58] sm:$0xff] }
  0x83   :  { %3496 = vst [vmem:[#allocation63_spill] sm:$0xff] %v2751_v11  ;;  %3497 = vst [vmem:[#allocation64_spill] sm:$0xff] %v2753_v8  ;;  %v2757_v3 = vld [vmem:[#allocation8 + $0x60] sm:$0xff]  ;;  %v2759_v0 = vld [vmem:[#allocation8 + $0x68] sm:$0xff] }
  0x84   :  { %3498 = vst [vmem:[#allocation65_spill] sm:$0xff] %v2755_v1  ;;  %3499 = vst [vmem:[#allocation66_spill] sm:$0xff] %v2757_v3  ;;  %v2761_v2 = vld [vmem:[#allocation8 + $0x70] sm:$0xff]  ;;  %v2763_v5 = vld [vmem:[#allocation8 + $0x78] sm:$0xff] }
  0x85   :  { %3500 = vst [vmem:[#allocation67_spill] sm:$0xff] %v2759_v0  ;;  %3501 = vst [vmem:[#allocation68_spill] sm:$0xff] %v2761_v2  ;;  %v2765_v7 = vld [vmem:[#allocation8 + $0x80] sm:$0xff]  ;;  %v2767_v4 = vld [vmem:[#allocation8 + $0x88] sm:$0xff] }
  0x86   :  { %3502 = vst [vmem:[#allocation69_spill] sm:$0xff] %v2763_v5  ;;  %3503 = vst [vmem:[#allocation70_spill] sm:$0xff] %v2765_v7  ;;  %v2769_v6 = vld [vmem:[#allocation8 + $0x90] sm:$0xff]  ;;  %v2771_v9 = vld [vmem:[#allocation8 + $0x98] sm:$0xff] }
  0x87   :  { %3504 = vst [vmem:[#allocation71_spill] sm:$0xff] %v2767_v4  ;;  %3505 = vst [vmem:[#allocation72_spill] sm:$0xff] %v2769_v6  ;;  %v2773_v11 = vld [vmem:[#allocation8 + $0xa0] sm:$0xff]  ;;  %v2775_v8 = vld [vmem:[#allocation8 + $0xa8] sm:$0xff] }
  0x88   :  { %3506 = vst [vmem:[#allocation73_spill] sm:$0xff] %v2771_v9  ;;  %3507 = vst [vmem:[#allocation74_spill] sm:$0xff] %v2773_v11  ;;  %v2777_v1 = vld [vmem:[#allocation8 + $0xb0] sm:$0xff]  ;;  %v2779_v3 = vld [vmem:[#allocation8 + $0xb8] sm:$0xff] }
  0x89   :  { %3508 = vst [vmem:[#allocation75_spill] sm:$0xff] %v2775_v8  ;;  %3509 = vst [vmem:[#allocation76_spill] sm:$0xff] %v2777_v1  ;;  %v2781_v0 = vld [vmem:[#allocation8 + $0xc0] sm:$0xff]  ;;  %v2783_v2 = vld [vmem:[#allocation8 + $0xc8] sm:$0xff] }
  0x8a   :  { %3510 = vst [vmem:[#allocation77_spill] sm:$0xff] %v2779_v3  ;;  %3511 = vst [vmem:[#allocation78_spill] sm:$0xff] %v2781_v0  ;;  %v2785_v5 = vld [vmem:[#allocation8 + $0xd0] sm:$0xff]  ;;  %v2787_v7 = vld [vmem:[#allocation8 + $0xd8] sm:$0xff] }
  0x8b   :  { %3512 = vst [vmem:[#allocation79_spill] sm:$0xff] %v2783_v2  ;;  %3513 = vst [vmem:[#allocation80_spill] sm:$0xff] %v2785_v5  ;;  %v2789_v4 = vld [vmem:[#allocation8 + $0xe0] sm:$0xff]  ;;  %v2791_v6 = vld [vmem:[#allocation8 + $0xe8] sm:$0xff] }
  0x8c   :  { %3514 = vst [vmem:[#allocation81_spill] sm:$0xff] %v2787_v7  ;;  %3515 = vst [vmem:[#allocation82_spill] sm:$0xff] %v2789_v4  ;;  %v2793_v9 = vld [vmem:[#allocation8 + $0xf0] sm:$0xff]  ;;  %v2795_v11 = vld [vmem:[#allocation8 + $0xf8] sm:$0xff] }
  0x8d   :  { %3516 = vst [vmem:[#allocation83_spill] sm:$0xff] %v2791_v6  ;;  %3517 = vst [vmem:[#allocation84_spill] sm:$0xff] %v2793_v9  ;;  %v2800_v8 = vld [vmem:[%s3323_s4] sm:$0xf]  ;;  %v2804_v1 = vld [vmem:[#allocation10 + $0x4] sm:$0xf] }
  0x8e   :  { %3518 = vst [vmem:[#allocation85_spill] sm:$0xff] %v2795_v11  ;;  %3519 = vst [vmem:[#allocation86_spill] sm:$0xff] %v2800_v8  ;;  %v2802_v3 = vld [vmem:[#allocation10] sm:$0xf]  ;;  %v2806_v2 = vld [vmem:[#allocation10 + $0x8] sm:$0xf] }
  0x8f   :  { %3520 = vst [vmem:[#allocation87_spill] sm:$0xff] %v2802_v3  ;;  %3521 = vst [vmem:[#allocation88_spill] sm:$0xff] %v2804_v1  ;;  %v2808_v7 = vld [vmem:[#allocation10 + $0xc] sm:$0xf]  ;;  %v2810_v0 = vld [vmem:[#allocation10 + $0x10] sm:$0xf] }
  0x90   :  { %3522 = vst [vmem:[#allocation89_spill] sm:$0xff] %v2806_v2  ;;  %3523 = vst [vmem:[#allocation90_spill] sm:$0xff] %v2808_v7  ;;  %v2812_v5 = vld [vmem:[#allocation10 + $0x14] sm:$0xf]  ;;  %v2814_v6 = vld [vmem:[#allocation10 + $0x18] sm:$0xf] }
  0x91   :  { %3524 = vst [vmem:[#allocation91_spill] sm:$0xff] %v2810_v0  ;;  %3525 = vst [vmem:[#allocation92_spill] sm:$0xff] %v2812_v5  ;;  %v2816_v11 = vld [vmem:[#allocation10 + $0x1c] sm:$0xf]  ;;  %v2818_v4 = vld [vmem:[#allocation10 + $0x20] sm:$0xf] }
  0x92   :  { %3526 = vst [vmem:[#allocation93_spill] sm:$0xff] %v2814_v6  ;;  %3527 = vst [vmem:[#allocation94_spill] sm:$0xff] %v2816_v11  ;;  %v2820_v9 = vld [vmem:[#allocation10 + $0x24] sm:$0xf]  ;;  %v2822_v8 = vld [vmem:[#allocation10 + $0x28] sm:$0xf] }
  0x93   :  { %3528 = vst [vmem:[#allocation95_spill] sm:$0xff] %v2818_v4  ;;  %3529 = vst [vmem:[#allocation96_spill] sm:$0xff] %v2820_v9  ;;  %v2824_v3 = vld [vmem:[#allocation10 + $0x2c] sm:$0xf]  ;;  %v2826_v1 = vld [vmem:[#allocation10 + $0x30] sm:$0xf] }
  0x94   :  { %3530 = vst [vmem:[#allocation97_spill] sm:$0xff] %v2822_v8  ;;  %3531 = vst [vmem:[#allocation98_spill] sm:$0xff] %v2824_v3  ;;  %v2828_v2 = vld [vmem:[#allocation10 + $0x34] sm:$0xf]  ;;  %v2830_v7 = vld [vmem:[#allocation10 + $0x38] sm:$0xf] }
  0x95   :  { %3532 = vst [vmem:[#allocation99_spill] sm:$0xff] %v2826_v1  ;;  %3533 = vst [vmem:[#allocation100_spill] sm:$0xff] %v2828_v2  ;;  %v2832_v0 = vld [vmem:[#allocation10 + $0x3c] sm:$0xf]  ;;  %v2837_v5 = vld [vmem:[%s3325_s6] ss:$0 sm:$0xff] }
  0x96   :  { %3534 = vst [vmem:[#allocation101_spill] sm:$0xff] %v2830_v7  ;;  %3535 = vst [vmem:[#allocation102_spill] sm:$0xff] %v2832_v0  ;;  %v2839_v6 = vld [vmem:[#allocation13] sm:$0xf]  ;;  %v2841_v11 = vld [vmem:[#allocation13 + $0x4] sm:$0xf] }
  0x97   :  { %3536 = vst [vmem:[#allocation103_spill] sm:$0xff] %v2837_v5  ;;  %3537 = vst [vmem:[#allocation104_spill] sm:$0xff] %v2839_v6  ;;  %v2843_v4 = vld [vmem:[#allocation13 + $0x8] sm:$0xf]  ;;  %v2845_v9 = vld [vmem:[#allocation13 + $0xc] sm:$0xf] }
  0x98   :  { %3538 = vst [vmem:[#allocation105_spill] sm:$0xff] %v2841_v11  ;;  %3539 = vst [vmem:[#allocation106_spill] sm:$0xff] %v2843_v4  ;;  %v2847_v8 = vld [vmem:[#allocation13 + $0x10] sm:$0xf]  ;;  %v2849_v3 = vld [vmem:[#allocation13 + $0x14] sm:$0xf] }
  0x99   :  { %3540 = vst [vmem:[#allocation107_spill] sm:$0xff] %v2845_v9  ;;  %3541 = vst [vmem:[#allocation108_spill] sm:$0xff] %v2847_v8  ;;  %v2851_v1 = vld [vmem:[#allocation13 + $0x18] sm:$0xf]  ;;  %v2853_v2 = vld [vmem:[#allocation13 + $0x1c] sm:$0xf] }
  0x9a   :  { %3542 = vst [vmem:[#allocation109_spill] sm:$0xff] %v2849_v3  ;;  %3543 = vst [vmem:[#allocation110_spill] sm:$0xff] %v2851_v1  ;;  %v2855_v7 = vld [vmem:[#allocation13 + $0x20] sm:$0xf]  ;;  %v2857_v0 = vld [vmem:[#allocation13 + $0x24] sm:$0xf] }
  0x9b   :  { %3544 = vst [vmem:[#allocation111_spill] sm:$0xff] %v2853_v2  ;;  %3545 = vst [vmem:[#allocation112_spill] sm:$0xff] %v2855_v7  ;;  %v2859_v5 = vld [vmem:[#allocation13 + $0x28] sm:$0xf]  ;;  %v2861_v6 = vld [vmem:[#allocation13 + $0x2c] sm:$0xf] }
  0x9c   :  { %3546 = vst [vmem:[#allocation113_spill] sm:$0xff] %v2857_v0  ;;  %3547 = vst [vmem:[#allocation114_spill] sm:$0xff] %v2859_v5  ;;  %v2863_v11 = vld [vmem:[#allocation13 + $0x30] sm:$0xf]  ;;  %v2865_v4 = vld [vmem:[#allocation13 + $0x34] sm:$0xf] }
  0x9d   :  { %3548 = vst [vmem:[#allocation115_spill] sm:$0xff] %v2861_v6  ;;  %3549 = vst [vmem:[#allocation116_spill] sm:$0xff] %v2863_v11  ;;  %v2867_v9 = vld [vmem:[#allocation13 + $0x38] sm:$0xf]  ;;  %v2869_v8 = vld [vmem:[#allocation13 + $0x3c] sm:$0xf] }
  0x9e   :  { %3550 = vst [vmem:[#allocation117_spill] sm:$0xff] %v2865_v4  ;;  %3551 = vst [vmem:[#allocation118_spill] sm:$0xff] %v2867_v9  ;;  %v2871_v3 = vld [vmem:[#allocation14] sm:$0xf]  ;;  %v2873_v1 = vld [vmem:[#allocation14 + $0x4] sm:$0xf] }
  0x9f   :  { %3552 = vst [vmem:[#allocation119_spill] sm:$0xff] %v2869_v8  ;;  %3553 = vst [vmem:[#allocation120_spill] sm:$0xff] %v2871_v3  ;;  %v2875_v2 = vld [vmem:[#allocation14 + $0x8] sm:$0xf]  ;;  %v2877_v7 = vld [vmem:[#allocation14 + $0xc] sm:$0xf] }
  0xa0   :  { %3554 = vst [vmem:[#allocation121_spill] sm:$0xff] %v2873_v1  ;;  %3555 = vst [vmem:[#allocation122_spill] sm:$0xff] %v2875_v2  ;;  %v2879_v0 = vld [vmem:[#allocation14 + $0x10] sm:$0xf]  ;;  %v2881_v5 = vld [vmem:[#allocation14 + $0x14] sm:$0xf] }
  0xa1   :  { %3556 = vst [vmem:[#allocation123_spill] sm:$0xff] %v2877_v7  ;;  %3557 = vst [vmem:[#allocation124_spill] sm:$0xff] %v2879_v0  ;;  %v2883_v6 = vld [vmem:[#allocation14 + $0x18] sm:$0xf]  ;;  %v2885_v11 = vld [vmem:[#allocation14 + $0x1c] sm:$0xf] }
  0xa2   :  { %3558 = vst [vmem:[#allocation125_spill] sm:$0xff] %v2881_v5  ;;  %3559 = vst [vmem:[#allocation126_spill] sm:$0xff] %v2883_v6  ;;  %v2887_v4 = vld [vmem:[#allocation14 + $0x20] sm:$0xf]  ;;  %v2889_v9 = vld [vmem:[#allocation14 + $0x24] sm:$0xf] }
  0xa3   :  { %3560 = vst [vmem:[#allocation127_spill] sm:$0xff] %v2885_v11  ;;  %3561 = vst [vmem:[#allocation128_spill] sm:$0xff] %v2887_v4  ;;  %v2891_v8 = vld [vmem:[#allocation14 + $0x28] sm:$0xf]  ;;  %v2893_v3 = vld [vmem:[#allocation14 + $0x2c] sm:$0xf] }
  0xa4   :  { %3562 = vst [vmem:[#allocation129_spill] sm:$0xff] %v2889_v9  ;;  %3563 = vst [vmem:[#allocation130_spill] sm:$0xff] %v2891_v8  ;;  %v2895_v1 = vld [vmem:[#allocation14 + $0x30] sm:$0xf]  ;;  %v2897_v2 = vld [vmem:[#allocation14 + $0x34] sm:$0xf] }
  0xa5   :  { %3564 = vst [vmem:[#allocation131_spill] sm:$0xff] %v2893_v3  ;;  %3565 = vst [vmem:[#allocation132_spill] sm:$0xff] %v2895_v1  ;;  %v2899_v7 = vld [vmem:[#allocation14 + $0x38] sm:$0xf]  ;;  %v2901_v0 = vld [vmem:[#allocation14 + $0x3c] sm:$0xf] }
  0xa6   :  { %3566 = vst [vmem:[#allocation133_spill] sm:$0xff] %v2897_v2  ;;  %3567 = vst [vmem:[#allocation134_spill] sm:$0xff] %v2899_v7  ;;  %v2906_v5 = vld [vmem:[%s3330_s11] ss:$0 sm:$0xff]  ;;  %v2199_v6 = vld [vmem:[#allocation11 + $0x38] sm:$0xff]  }
  0xa7   :  { %3568 = vst [vmem:[#allocation135_spill] sm:$0xff] %v2901_v0  ;;  %3569 = vst [vmem:[#allocation136_spill] sm:$0xff] %v2906_v5  ;;  %v2200_v11 = vld [vmem:[#allocation11 + $0x30] sm:$0xff]   ;;  %2025 = vmatprep.subr.bf16.mxu0 %v2199_v6  ;;  %v2201_v4 = vld [vmem:[#allocation11 + $0x28] sm:$0xff]  }
  0xa8   :  { %2026 = vmatpush3.bf16.msra.mxu0 %v2199_v6  ;;  %v2202_v9 = vld [vmem:[#allocation11 + $0x20] sm:$0xff]   ;;  %v153_v3 = vld [vmem:[#allocation2 + $0x8] sm:$0xff]  ;;  %v2203_v2 = vld [vmem:[#allocation11 + $0x18] sm:$0xff]  }
  0xa9   :  { %2027 = vmatprep.subr.bf16.mxu0 %v2200_v11  ;;  %v152_v8 = vld [vmem:[#allocation2] sm:$0xff]   ;;  %v2204_v5 = vld [vmem:[#allocation11 + $0x10] sm:$0xff]   ;;  %v2205_v6 = vld [vmem:[#allocation11 + $0x8] sm:$0xff]  }
  0xaa   :  { %v2908_v1 = vpack.c.bf16 %v153_v3, %v152_v8  ;;  %v154_v7 = vld [vmem:[#allocation2 + $0x10] sm:$0xff]   ;;  %v155_v0 = vld [vmem:[#allocation2 + $0x18] sm:$0xff] }
  0xab   :  { %v2911_v3 = vpack.c.bf16 %v155_v0, %v154_v7 }
  0xac   :  { %2028 = vmatpush3.bf16.msra.mxu0 %v2200_v11  ;;  %3570 = vst [vmem:[#allocation137_spill] sm:$0xff] %v2908_v1  ;;  %2041 = vmatprep.mubr.bf16.mxu0 %v2908_v1  ;;  %v2206_v11 = vld [vmem:[#allocation11] sm:$0xff]  }
  0xad   :  { %2029 = vmatprep.subr.bf16.mxu0 %v2201_v4  ;;  %3571 = vst [vmem:[#allocation138_spill] sm:$0xff] %v2911_v3 }
  0xb0   :  { %2030 = vmatpush3.bf16.msra.mxu0 %v2201_v4  ;;  %v3384_v4 = vlaneseq }
  0xb1   :  { %2031 = vmatprep.subr.bf16.mxu0 %v2202_v9 }
  0xb4   :  { %2032 = vmatpush3.bf16.msra.mxu0 %v2202_v9  ;;  %v2915_v9 = vand.u32 127, %v3384_v4 }
  0xb5   :  { %2033 = vmatprep.subr.bf16.mxu0 %v2203_v2 }
  0xb6   :  { %3572 = vst [vmem:[#allocation139_spill] sm:$0xff] %v2915_v9  ;;  %vm433_vm0 = vcmp.eq.s32.totalorder %v2915_v9, 0 }
  0xb8   :  { %2034 = vmatpush3.bf16.msra.mxu0 %v2203_v2  ;;  %v2487_v2 = vmov 0.0  }
  0xb9   :  { %2035 = vmatprep.subr.bf16.mxu0 %v2204_v5  ;;  %v1850_v1 = vsel %vm433_vm0, 1.0, %v2487_v2   ;;  %v2931_v2 = vmov 0.0  }
  0xbc   :  { %2036 = vmatpush3.bf16.msra.mxu0 %v2204_v5 }
  0xbd   :  { %2037 = vmatprep.subr.bf16.mxu0 %v2205_v6 }
  0xc0   :  { %2038 = vmatpush3.bf16.msra.mxu0 %v2205_v6  ;;  %v1841_v6 = vld [vmem:[%s3327_s8] ss:$0 sm:$0xff]  ;;  %s2935_s8 = smov 0  }
  0xc1   :  { %2039 = vmatprep.subr.bf16.mxu0 %v2206_v11 }
  0xc4   :  { %2040 = vmatpush3.bf16.msra.mxu0 %v2206_v11 }
  0xc7   :  { %2042 = vmatmul.mubr.bf16.vlgmr.msra.gmra.mxu0 %v2911_v3 }
 0x187   :  { %v2043_v5 = vpop.f32.mrf.mxu0 }
 0x188   :  { %v419_v13 = vadd.f32 %v2043_v5, %v1841_v6 }
 0x189   :  { %v410_v10 = vpop.f32.mrf.mxu0 }
 0x18a   :  { %v411_v15 = vadd.f32 %v1841_v6, %v410_v10  ;;  %v427_v3 = vmax.f32 %v419_v13, 0.0  ;;  %v2933_v10 = vmov 0.0  }
 0x18b   :  { %v2044_v0 = vpop.f32.mrf.mxu0 }
 0x18c   :  { %v422_v11 = vadd.f32 %v2044_v0, %v1841_v6  ;;  %v425_v4 = vmax.f32 %v411_v15, 0.0 }
 0x18d   :  { %v413_v12 = vpop.f32.mrf.mxu0 }
 0x18e   :  { %v428_v14 = vmax.f32 %v422_v11, 0.0  ;;  %v414_v17 = vadd.f32 %v1841_v6, %v413_v12 }
 0x190   :  { %v2921_v19 = vpack.c.bf16 %v428_v14, %v427_v3  ;;  %v426_v9 = vmax.f32 %v414_v17, 0.0 }
 0x192   :  { %v2923_v16 = vpack.c.bf16 %v426_v9, %v425_v4 }
 0x194   :  { %3573 = vst [vmem:[#allocation140_spill] sm:$0xff] %v2923_v16 }
 0x195 LB: > { %v3574_v30 = vld [vmem:[#allocation53_spill] sm:$0xff]  ;;  %v3575_v29 = vld [vmem:[#allocation52_spill] sm:$0xff]  ;;  %v3576_v28 = vld [vmem:[#allocation51_spill] sm:$0xff]  ;;  %v1880_v12 = vcombine.high %v2725_v60, %v2729_v62  ;;  %v1882_v13 = vcombine.high %v2727_v61, %v2731_v63  ;;  %v1879_v14 = vcombine.low %v2725_v60, %v2729_v62  ;;  %v1881_v15 = vcombine.low %v2727_v61, %v2731_v63  ;;  %s1978_s28 = sshll.u32 %s2471_s8, 1  ;;  %s441_s8 = sadd.s32 1, %s2471_s8   ;;  %s2471_s8 = sphi %s2935_s8, %s441_s8   ;;  %v2467_v10 = vphi %v2933_v10, %v3205_v10   ;;  %v2463_v2 = vphi %v2931_v2, %v3202_v2   ;;  %v2459_v1 = vphi %v1850_v1, %v1979_v1   ;;  %v2455_v8 = vphi %v152_v8, %v3281_v8   ;;  %v2451_v7 = vphi %v154_v7, %v3283_v7  }
 0x196   : > { %v3577_v27 = vld [vmem:[#allocation50_spill] sm:$0xff]  ;;  %v3578_v26 = vld [vmem:[#allocation49_spill] sm:$0xff]  ;;  %v3579_v25 = vld [vmem:[#allocation48_spill] sm:$0xff]  ;;  %v1876_v17 = vcombine.high %v2717_v56, %v2721_v58  ;;  %v1878_v3 = vcombine.high %v2719_v57, %v2723_v59  ;;  %v1875_v4 = vcombine.low %v2717_v56, %v2721_v58  ;;  %v1877_v9 = vcombine.low %v2719_v57, %v2723_v59  ;;  %s1773_s29 = scalar_lea.vmem [#allocation16], %s1978_s28  ;;  %p438_p12 = scmp.ge.s32.totalorder %s441_s8, 8  }
 0x197   : > { %v3580_v24 = vld [vmem:[#allocation47_spill] sm:$0xff]  ;;  %v3581_v23 = vld [vmem:[#allocation46_spill] sm:$0xff]  ;;  %v3582_v18 = vld [vmem:[#allocation41_spill] sm:$0xff]  ;;  %619 = vmatprep.subr.bf16.mxu0 %v1880_v12  ;;  %660 = vmatprep.subr.bf16.mxu1 %v1882_v13  ;;  %v1872_v5 = vcombine.high %v2709_v52, %v2713_v54  ;;  %v1874_v6 = vcombine.high %v2711_v53, %v2715_v55  ;;  %v3389_v0 = vmov 0   ;;  %v1871_v11 = vcombine.low %v2709_v52, %v2713_v54  ;;  %s2492_s30 = smov (%p438_p12), [#allocation16]  }
 0x198   : > { %v3583_v22 = vld [vmem:[#allocation45_spill] sm:$0xff]  ;;  %v3584_v21 = vld [vmem:[#allocation44_spill] sm:$0xff]  ;;  %v3585_v20 = vld [vmem:[#allocation43_spill] sm:$0xff]  ;;  %620 = vmatpush1.bf16.msra.mxu0 %v1879_v14  ;;  %661 = vmatpush1.bf16.msra.mxu1 %v1881_v15  ;;  %v1873_v12 = vcombine.low %v2711_v53, %v2715_v55  ;;  %v1868_v13 = vcombine.high %v2701_v48, %v2705_v50  ;;  %v1870_v14 = vcombine.high %v2703_v49, %v2707_v51  ;;  %vm455_vm1 = vcmask 1041409   ;;  %s1803_s13 = sshll.u32 (%p438_p12), %s2492_s30, 4  ;;  %s1804_s13 = int_to_ptr.vmem [resolvable:$true] %s1803_s13 }
 0x199   : > { %621 = vmatprep.subr.bf16.mxu0 %v1876_v17  ;;  %662 = vmatprep.subr.bf16.mxu1 %v1878_v3  ;;  %v1867_v15 = vcombine.low %v2701_v48, %v2705_v50  ;;  %v1869_v17 = vcombine.low %v2703_v49, %v2707_v51  ;;  %v1864_v3 = vcombine.high %v2693_v44, %v2697_v46  ;;  %vm2490_vm2 = vmmov 0   ;;  %s2393_s14 = scalar_lea.vmem (%p438_p12), %s1804_s13, 256  ;;  %p2398_p0 = scmp.lt.s32.totalorder (%p438_p12), %s1804_s13, %s1804_s13 }
 0x19a   : > { %651 = vmatprep.mubr.bf16.mxu0 %v3389_v0  ;;  %692 = vmatprep.mubr.bf16.mxu1 %v3389_v0  ;;  %vm1447_vm3 = vcmask 123904   ;;  %vm1478_vm4 = vcmask 130048   ;;  %vm1758_vm5 = vcmask 1041408   ;;  %p2394_p13 = scmp.ne.s32.totalorder (%p438_p12), %s1804_s13, %s2393_s14  ;;  %p2399_p1 = scmp.lt.s32.totalorder (%p438_p12), %s2393_s14, %s2393_s14 }
 0x19b   : > { %v3643_v16 = vld [vmem:[#allocation140_spill] sm:$0xff] }
 0x19c   : > { %622 = vmatpush1.bf16.msra.mxu0 %v1875_v4  ;;  %663 = vmatpush1.bf16.msra.mxu1 %v1877_v9  ;;  %v1866_v4 = vcombine.high %v2695_v45, %v2699_v47  ;;  %v1863_v9 = vcombine.low %v2693_v44, %v2697_v46  ;;  %p2400_p2 = por (%p438_p12), %p2399_p1, %p2398_p0 }
 0x19d   : > { %623 = vmatprep.subr.bf16.mxu0 %v1872_v5  ;;  %664 = vmatprep.subr.bf16.mxu1 %v1874_v6  ;;  %v1865_v5 = vcombine.low %v2695_v45, %v2699_v47  ;;  %v449_v6 = vpack.c.bf16 %v2451_v7, %v2451_v7 }
 0x19e   :  { %p2401_p3 = pnand (%p438_p12), %p2400_p2, %p2394_p13 }
 0x19f   : > { %v453_v7 = vunpack.c.l.b16 %v449_v6  ;;  %v1854_v6 = vcombine.high %v2671_v33, %v2675_v35 }
 0x1a0   : > { %624 = vmatpush1.bf16.msra.mxu0 %v1871_v11  ;;  %665 = vmatpush1.bf16.msra.mxu1 %v1873_v12  ;;  %v1860_v11 = vcombine.high %v2685_v40, %v2689_v42  ;;  %v1862_v12 = vcombine.high %v2687_v41, %v2691_v43 }
 0x1a1   : > { %625 = vmatprep.subr.bf16.mxu0 %v1868_v13  ;;  %666 = vmatprep.subr.bf16.mxu1 %v1870_v14  ;;  %v1859_v13 = vcombine.low %v2685_v40, %v2689_v42  ;;  %v1861_v14 = vcombine.low %v2687_v41, %v2691_v43  ;;  %v454_v0 = vrot.slane %v453_v7, 7 }
 0x1a4   : > { %626 = vmatpush1.bf16.msra.mxu0 %v1867_v15  ;;  %667 = vmatpush1.bf16.msra.mxu1 %v1869_v17  ;;  %v448_v15 = vpack.c.bf16 %v2455_v8, %v2455_v8  ;;  %v1856_v17 = vcombine.high %v2677_v36, %v2681_v38  ;;  %v1852_v8 = vcombine.high %v2669_v32, %v2673_v34 }
 0x1a5   : > { %627 = vmatprep.subr.bf16.mxu0 %v1864_v3  ;;  %668 = vmatprep.subr.bf16.mxu1 %v1866_v4  ;;  %v1858_v3 = vcombine.high %v2679_v37, %v2683_v39  ;;  %v1855_v4 = vcombine.low %v2677_v36, %v2681_v38 }
 0x1a8   : > { %628 = vmatpush1.bf16.msra.mxu0 %v1863_v9  ;;  %669 = vmatpush1.bf16.msra.mxu1 %v1865_v5  ;;  %v1857_v9 = vcombine.low %v2679_v37, %v2683_v39  ;;  %v452_v5 = vunpack.c.l.b16 %v448_v15  ;;  %v1914_v15 = vcombine.high %v3575_v29, %v2667_v31 }
 0x1a9   : > { %629 = vmatprep.subr.bf16.mxu0 %v1860_v11  ;;  %670 = vmatprep.subr.bf16.mxu1 %v1862_v12  ;;  %v1851_v11 = vcombine.low %v2669_v32, %v2673_v34  ;;  %v1853_v12 = vcombine.low %v2671_v33, %v2675_v35 }
 0x1ac   : > { %630 = vmatpush1.bf16.msra.mxu0 %v1859_v13  ;;  %671 = vmatpush1.bf16.msra.mxu1 %v1861_v14  ;;  %v456_v13 = vsel %vm455_vm1, %v454_v0, %v452_v5  ;;  %v1912_v14 = vcombine.high %v3576_v28, %v3574_v30  ;;  %v1908_v0 = vcombine.high %v3580_v24, %v3578_v26 }
 0x1ad   : > { %631 = vmatprep.subr.bf16.mxu0 %v1856_v17  ;;  %672 = vmatprep.subr.bf16.mxu1 %v1858_v3  ;;  %v457_v7 = vpack.c.b16 %v456_v13, %v456_v13  ;;  %v1911_v17 = vcombine.low %v3576_v28, %v3574_v30  ;;  %v1913_v3 = vcombine.low %v3575_v29, %v2667_v31 }
 0x1ae   : > { %v1909_v5 = vcombine.low %v3579_v25, %v3577_v27  ;;  %v1905_v13 = vcombine.low %v3584_v21, %v3581_v23 }
 0x1b0   : > { %632 = vmatpush1.bf16.msra.mxu0 %v1855_v4  ;;  %673 = vmatpush1.bf16.msra.mxu1 %v1857_v9  ;;  %v1910_v4 = vcombine.high %v3579_v25, %v3577_v27  ;;  %v1907_v9 = vcombine.low %v3580_v24, %v3578_v26 }
 0x1b1   : > { %633 = vmatprep.subr.bf16.mxu0 %v1852_v8  ;;  %674 = vmatprep.subr.bf16.mxu1 %v1854_v6  ;;  %v1904_v8 = vcombine.high %v3585_v20, %v3583_v22  ;;  %v1906_v6 = vcombine.high %v3584_v21, %v3581_v23  ;;  %v3594_v21 = vld [vmem:[#allocation36_spill] sm:$0xff] }
 0x1b4   : > { %634 = vmatpush1.bf16.msra.mxu0 %v1851_v11  ;;  %675 = vmatpush1.bf16.msra.mxu1 %v1853_v12  ;;  %v3586_v11 = vmov 0   ;;  %v1903_v12 = vcombine.low %v3585_v20, %v3583_v22  ;;  %v3592_v20 = vld [vmem:[#allocation35_spill] sm:$0xff] }
 0x1b5   : > { %861 = vmatprep.subr.bf16.mxu0 %v1912_v14  ;;  %902 = vmatprep.subr.bf16.mxu1 %v1914_v15  ;;  %v3587_v14 = vld [vmem:[#allocation39_spill] sm:$0xff] }
 0x1b6   : > { %v1900_v15 = vcombine.high %v3587_v14, %v3582_v18 }
 0x1b7   : > { %652 = vmatmul.mubr.bf16.vlgmr.msra.gmra.mxu0 %v457_v7  ;;  %693 = vmatmul.mubr.bf16.vlgmr.msra.gmra.mxu1 %v457_v7  ;;  %v3588_v7 = vld [vmem:[#allocation42_spill] sm:$0xff] }
 0x1b8   : > { %862 = vmatpush1.bf16.msra.mxu0 %v1911_v17  ;;  %903 = vmatpush1.bf16.msra.mxu1 %v1913_v3  ;;  %v3589_v17 = vmov %v3588_v7  ;;  %v3590_v3 = vld [vmem:[#allocation40_spill] sm:$0xff] }
 0x1b9   : > { %863 = vmatprep.subr.bf16.mxu0 %v1908_v0  ;;  %904 = vmatprep.subr.bf16.mxu1 %v1910_v4  ;;  %v1902_v0 = vcombine.high %v3590_v3, %v3588_v7  ;;  %v1899_v4 = vcombine.low %v3587_v14, %v3582_v18  ;;  %v3595_v7 = vld [vmem:[#allocation33_spill] sm:$0xff] }
 0x1ba   : > { %893 = vmatprep.mubr.bf16.mxu0 %v3586_v11  ;;  %934 = vmatprep.mubr.bf16.mxu1 %v3586_v11  ;;  %v3596_v14 = vmov %v3595_v7 }
 0x1bc   : > { %864 = vmatpush1.bf16.msra.mxu0 %v1907_v9  ;;  %905 = vmatpush1.bf16.msra.mxu1 %v1909_v5  ;;  %v1901_v9 = vcombine.low %v3590_v3, %v3589_v17  ;;  %v3591_v5 = vld [vmem:[#allocation37_spill] sm:$0xff]  ;;  %v3597_v3 = vld [vmem:[#allocation31_spill] sm:$0xff]  ;;  %v3599_v17 = vld [vmem:[#allocation32_spill] sm:$0xff] }
 0x1bd   : > { %865 = vmatprep.subr.bf16.mxu0 %v1904_v8  ;;  %906 = vmatprep.subr.bf16.mxu1 %v1906_v6  ;;  %v1896_v8 = vcombine.high %v3592_v20, %v3591_v5  ;;  %v3593_v6 = vld [vmem:[#allocation38_spill] sm:$0xff] }
 0x1be   : > { %v1898_v22 = vcombine.high %v3594_v21, %v3593_v6 }
 0x1c0   : > { %866 = vmatpush1.bf16.msra.mxu0 %v1903_v12  ;;  %907 = vmatpush1.bf16.msra.mxu1 %v1905_v13  ;;  %v1895_v12 = vcombine.low %v3592_v20, %v3591_v5  ;;  %v1897_v13 = vcombine.low %v3594_v21, %v3593_v6  ;;  %v3600_v5 = vld [vmem:[#allocation29_spill] sm:$0xff]  ;;  %v3601_v6 = vld [vmem:[#allocation27_spill] sm:$0xff]  ;;  %v3603_v20 = vld [vmem:[#allocation28_spill] sm:$0xff] }
 0x1c1   : > { %867 = vmatprep.subr.bf16.mxu0 %v1900_v15  ;;  %908 = vmatprep.subr.bf16.mxu1 %v1902_v0  ;;  %v1892_v15 = vcombine.high %v3597_v3, %v3595_v7  ;;  %v3598_v0 = vld [vmem:[#allocation34_spill] sm:$0xff]  ;;  %v3604_v7 = vld [vmem:[#allocation25_spill] sm:$0xff] }
 0x1c2   : > { %v1894_v18 = vcombine.high %v3599_v17, %v3598_v0 }
 0x1c4   : > { %868 = vmatpush1.bf16.msra.mxu0 %v1899_v4  ;;  %909 = vmatpush1.bf16.msra.mxu1 %v1901_v9  ;;  %v1891_v4 = vcombine.low %v3597_v3, %v3596_v14  ;;  %v1893_v9 = vcombine.low %v3599_v17, %v3598_v0  ;;  %v3605_v3 = vmov %v3604_v7  ;;  %v3606_v0 = vld [vmem:[#allocation23_spill] sm:$0xff]  ;;  %v3608_v14 = vld [vmem:[#allocation24_spill] sm:$0xff] }
 0x1c5   : > { %869 = vmatprep.subr.bf16.mxu0 %v1896_v8  ;;  %910 = vmatprep.subr.bf16.mxu1 %v1898_v22  ;;  %v1888_v8 = vcombine.high %v3601_v6, %v3600_v5  ;;  %v3602_v22 = vld [vmem:[#allocation30_spill] sm:$0xff] }
 0x1c6   : > { %v1890_v21 = vcombine.high %v3603_v20, %v3602_v22 }
 0x1c8   : > { %870 = vmatpush1.bf16.msra.mxu0 %v1895_v12  ;;  %911 = vmatpush1.bf16.msra.mxu1 %v1897_v13  ;;  %v1887_v12 = vcombine.low %v3601_v6, %v3600_v5  ;;  %v1889_v13 = vcombine.low %v3603_v20, %v3602_v22  ;;  %v3609_v5 = vld [vmem:[#allocation84_spill] sm:$0xff]  ;;  %v3610_v6 = vld [vmem:[#allocation82_spill] sm:$0xff]  ;;  %v3612_v20 = vld [vmem:[#allocation83_spill] sm:$0xff] }
 0x1c9   : > { %871 = vmatprep.subr.bf16.mxu0 %v1892_v15  ;;  %912 = vmatprep.subr.bf16.mxu1 %v1894_v18  ;;  %v1884_v15 = vcombine.high %v3606_v0, %v3604_v7  ;;  %v3607_v18 = vld [vmem:[#allocation26_spill] sm:$0xff]  ;;  %v447_v7 = vpack.c.bf16 %v2459_v1, %v2459_v1 }
 0x1ca   : > { %v1886_v17 = vcombine.high %v3608_v14, %v3607_v18 }
 0x1cc   : > { %872 = vmatpush1.bf16.msra.mxu0 %v1891_v4  ;;  %913 = vmatpush1.bf16.msra.mxu1 %v1893_v9  ;;  %v1883_v4 = vcombine.low %v3606_v0, %v3605_v3  ;;  %v1885_v9 = vcombine.low %v3608_v14, %v3607_v18  ;;  %v3615_v3 = vld [vmem:[#allocation81_spill] sm:$0xff]  ;;  %v3616_v14 = vld [vmem:[#allocation79_spill] sm:$0xff] }
 0x1cd   : > { %873 = vmatprep.subr.bf16.mxu0 %v1888_v8  ;;  %914 = vmatprep.subr.bf16.mxu1 %v1890_v21  ;;  %v1944_v8 = vcombine.high %v3610_v6, %v3609_v5  ;;  %v3611_v21 = vld [vmem:[#allocation85_spill] sm:$0xff]  ;;  %v1942_v18 = vcombine.high %v3616_v14, %v3615_v3 }
 0x1ce   : > { %v1946_v22 = vcombine.high %v3612_v20, %v3611_v21 }
 0x1d0   : > { %874 = vmatpush1.bf16.msra.mxu0 %v1887_v12  ;;  %915 = vmatpush1.bf16.msra.mxu1 %v1889_v13  ;;  %v1943_v12 = vcombine.low %v3610_v6, %v3609_v5  ;;  %v1945_v13 = vcombine.low %v3612_v20, %v3611_v21  ;;  %v3619_v5 = vld [vmem:[#allocation77_spill] sm:$0xff]  ;;  %v3620_v6 = vld [vmem:[#allocation75_spill] sm:$0xff] }
 0x1d1   : > { %875 = vmatprep.subr.bf16.mxu0 %v1884_v15  ;;  %916 = vmatprep.subr.bf16.mxu1 %v1886_v17  ;;  %v3613_v17 = vld [vmem:[#allocation80_spill] sm:$0xff]  ;;  %v3614_v15 = vld [vmem:[#allocation78_spill] sm:$0xff]  ;;  %v1938_v20 = vcombine.high %v3620_v6, %v3619_v5 }
 0x1d2   : > { %v1940_v0 = vcombine.high %v3614_v15, %v3613_v17  ;;  %v1939_v1 = vcombine.low %v3614_v15, %v3613_v17 }
 0x1d4   : > { %876 = vmatpush1.bf16.msra.mxu0 %v1883_v4  ;;  %917 = vmatpush1.bf16.msra.mxu1 %v1885_v9  ;;  %v1941_v4 = vcombine.low %v3616_v14, %v3615_v3  ;;  %v3617_v9 = vld [vmem:[#allocation76_spill] sm:$0xff]  ;;  %v3623_v3 = vld [vmem:[#allocation73_spill] sm:$0xff]  ;;  %v3624_v14 = vld [vmem:[#allocation71_spill] sm:$0xff] }
 0x1d5   : > { %1104 = vmatprep.subr.bf16.mxu0 %v1944_v8  ;;  %1145 = vmatprep.subr.bf16.mxu1 %v1946_v22  ;;  %v3618_v22 = vld [vmem:[#allocation74_spill] sm:$0xff]  ;;  %v1934_v15 = vcombine.high %v3624_v14, %v3623_v3 }
 0x1d6   : > { %v1936_v8 = vcombine.high %v3618_v22, %v3617_v9 }
 0x1d7   : > { %894 = vmatmul.mubr.bf16.vlgmr.msra.gmra.mxu0 %v447_v7  ;;  %935 = vmatmul.mubr.bf16.vlgmr.msra.gmra.mxu1 %v447_v7  ;;  %v1935_v7 = vcombine.low %v3618_v22, %v3617_v9 }
 0x1d8   : > { %1105 = vmatpush1.bf16.msra.mxu0 %v1943_v12  ;;  %1146 = vmatpush1.bf16.msra.mxu1 %v1945_v13  ;;  %v1937_v12 = vcombine.low %v3620_v6, %v3619_v5  ;;  %v3626_v5 = vld [vmem:[#allocation66_spill] sm:$0xff]  ;;  %v3628_v6 = vld [vmem:[#allocation67_spill] sm:$0xff] }
 0x1d9   : > { %1106 = vmatprep.subr.bf16.mxu0 %v1940_v0  ;;  %1147 = vmatprep.subr.bf16.mxu1 %v1942_v18  ;;  %v3621_v0 = vld [vmem:[#allocation72_spill] sm:$0xff]  ;;  %v3622_v18 = vld [vmem:[#allocation70_spill] sm:$0xff] }
 0x1da   : > { %1136 = vmatprep.mubr.bf16.mxu0 %v3586_v11  ;;  %1177 = vmatprep.mubr.bf16.mxu1 %v3586_v11  ;;  %v1932_v13 = vcombine.high %v3622_v18, %v3621_v0  ;;  %v1931_v11 = vcombine.low %v3622_v18, %v3621_v0  ;;  %v3629_v0 = vld [vmem:[#allocation64_spill] sm:$0xff] }
 0x1dc   : > { %1107 = vmatpush1.bf16.msra.mxu0 %v1939_v1  ;;  %1148 = vmatpush1.bf16.msra.mxu1 %v1941_v4  ;;  %v1933_v1 = vcombine.low %v3624_v14, %v3623_v3  ;;  %v3625_v4 = vld [vmem:[#allocation68_spill] sm:$0xff]  ;;  %v3630_v3 = vld [vmem:[#allocation62_spill] sm:$0xff]  ;;  %v3632_v14 = vld [vmem:[#allocation63_spill] sm:$0xff] }
 0x1dd   : > { %1108 = vmatprep.subr.bf16.mxu0 %v1936_v8  ;;  %1149 = vmatprep.subr.bf16.mxu1 %v1938_v20  ;;  %v1928_v8 = vcombine.high %v3626_v5, %v3625_v4  ;;  %v3627_v20 = vld [vmem:[#allocation69_spill] sm:$0xff] }
 0x1de   : > { %v1930_v9 = vcombine.high %v3628_v6, %v3627_v20 }
 0x1e0   : > { %1109 = vmatpush1.bf16.msra.mxu0 %v1935_v7  ;;  %1150 = vmatpush1.bf16.msra.mxu1 %v1937_v12  ;;  %v1927_v7 = vcombine.low %v3626_v5, %v3625_v4  ;;  %v1929_v12 = vcombine.low %v3628_v6, %v3627_v20  ;;  %v3633_v4 = vld [vmem:[#allocation60_spill] sm:$0xff]  ;;  %v3634_v5 = vld [vmem:[#allocation58_spill] sm:$0xff]  ;;  %v3636_v6 = vld [vmem:[#allocation59_spill] sm:$0xff]  ;;  %v3658_v20 = vlaneseq }
 0x1e1   : > { %1110 = vmatprep.subr.bf16.mxu0 %v1932_v13  ;;  %1151 = vmatprep.subr.bf16.mxu1 %v1934_v15  ;;  %v1924_v13 = vcombine.high %v3630_v3, %v3629_v0  ;;  %v3631_v15 = vld [vmem:[#allocation65_spill] sm:$0xff] }
 0x1e2   : > { %v1926_v17 = vcombine.high %v3632_v14, %v3631_v15 }
 0x1e4   : > { %1111 = vmatpush1.bf16.msra.mxu0 %v1931_v11  ;;  %1152 = vmatpush1.bf16.msra.mxu1 %v1933_v1  ;;  %v1923_v11 = vcombine.low %v3630_v3, %v3629_v0  ;;  %v1925_v1 = vcombine.low %v3632_v14, %v3631_v15  ;;  %v3637_v0 = vld [vmem:[#allocation56_spill] sm:$0xff]  ;;  %v3638_v3 = vld [vmem:[#allocation54_spill] sm:$0xff]  ;;  %v3640_v14 = vld [vmem:[#allocation55_spill] sm:$0xff] }
 0x1e5   : > { %1112 = vmatprep.subr.bf16.mxu0 %v1928_v8  ;;  %1153 = vmatprep.subr.bf16.mxu1 %v1930_v9  ;;  %v1920_v8 = vcombine.high %v3634_v5, %v3633_v4  ;;  %v3635_v9 = vld [vmem:[#allocation61_spill] sm:$0xff] }
 0x1e6   : > { %v1922_v18 = vcombine.high %v3636_v6, %v3635_v9 }
 0x1e8   : > { %1113 = vmatpush1.bf16.msra.mxu0 %v1927_v7  ;;  %1154 = vmatpush1.bf16.msra.mxu1 %v1929_v12  ;;  %v1919_v7 = vcombine.low %v3634_v5, %v3633_v4  ;;  %v1921_v12 = vcombine.low %v3636_v6, %v3635_v9  ;;  %v3642_v4 = vld [vmem:[#allocation101_spill] sm:$0xff] }
 0x1e9   : > { %1114 = vmatprep.subr.bf16.mxu0 %v1924_v13  ;;  %1155 = vmatprep.subr.bf16.mxu1 %v1926_v17  ;;  %v1916_v13 = vcombine.high %v3638_v3, %v3637_v0  ;;  %v3639_v17 = vld [vmem:[#allocation57_spill] sm:$0xff] }
 0x1ea   : > { %v1918_v15 = vcombine.high %v3640_v14, %v3639_v17 }
 0x1ec   : > { %1115 = vmatpush1.bf16.msra.mxu0 %v1923_v11  ;;  %1156 = vmatpush1.bf16.msra.mxu1 %v1925_v1  ;;  %v1915_v11 = vcombine.low %v3638_v3, %v3637_v0  ;;  %v1917_v1 = vcombine.low %v3640_v14, %v3639_v17  ;;  %v3656_v0 = vld [vmem:[#allocation88_spill] sm:$0xff] }
 0x1ed   : > { %1116 = vmatprep.subr.bf16.mxu0 %v1920_v8  ;;  %1157 = vmatprep.subr.bf16.mxu1 %v1922_v18  ;;  %v943_v8 = vpack.c.bf16 %v2467_v10, %v2467_v10  ;;  %v3641_v18 = vld [vmem:[#allocation102_spill] sm:$0xff]  ;;  %v3644_v10 = vld [vmem:[#allocation100_spill] sm:$0xff] }
 0x1ee   : > { %v1958_v5 = vcombine.low %v3642_v4, %v3641_v18  ;;  %v3647_v4 = vld [vmem:[#allocation97_spill] sm:$0xff] }
 0x1f0   : > { %1117 = vmatpush1.bf16.msra.mxu0 %v1919_v7  ;;  %1158 = vmatpush1.bf16.msra.mxu1 %v1921_v12  ;;  %v3444_v7 = vmov 0.0  }
 0x1f1   : > { %1118 = vmatprep.subr.bf16.mxu0 %v1916_v13  ;;  %1159 = vmatprep.subr.bf16.mxu1 %v1918_v15  ;;  %v3645_v15 = vld [vmem:[#allocation99_spill] sm:$0xff]  ;;  %v3646_v13 = vld [vmem:[#allocation98_spill] sm:$0xff] }
 0x1f2   : > { %v1957_v12 = vcombine.low %v3645_v15, %v3644_v10  ;;  %v3651_v10 = vld [vmem:[#allocation93_spill] sm:$0xff] }
 0x1f4   : > { %1119 = vmatpush1.bf16.msra.mxu0 %v1915_v11  ;;  %1160 = vmatpush1.bf16.msra.mxu1 %v1917_v1  ;;  %v1956_v11 = vcombine.low %v3647_v4, %v3646_v13  ;;  %v3648_v1 = vld [vmem:[#allocation96_spill] sm:$0xff]  ;;  %v3653_v13 = vld [vmem:[#allocation91_spill] sm:$0xff] }
 0x1f5   : > { %2045 = vmatprep.subr.bf16.mxu0 %v3444_v7  ;;  %2065 = vmatprep.subr.bf16.mxu1 %v3444_v7 }
 0x1f7   : > { %1137 = vmatmul.mubr.bf16.vlgmr.msra.gmra.mxu0 %v943_v8  ;;  %1178 = vmatmul.mubr.bf16.vlgmr.msra.gmra.mxu1 %v943_v8  ;;  %v3649_v8 = vld [vmem:[#allocation95_spill] sm:$0xff] }
 0x1f8   : > { %2046 = vmatpush3.bf16.msra.mxu0 %v1958_v5  ;;  %2066 = vmatpush3.bf16.xpose.msra.mxu1 %v3643_v16  ;;  %v1955_v18 = vcombine.low %v3649_v8, %v3648_v1  ;;  %v3650_v5 = vld [vmem:[#allocation94_spill] sm:$0xff]  ;;  %v3655_v1 = vld [vmem:[#allocation89_spill] sm:$0xff] }
 0x1f9   : > { %2047 = vmatprep.subr.bf16.mxu0 %v3444_v7  ;;  %2071 = vmatprep.subr.bf16.mxu1 %v3444_v7  ;;  %v1954_v15 = vcombine.low %v3651_v10, %v3650_v5 }
 0x1fa   : > { %2061 = vmatprep.mubr.msk.bf16.mxu0 %vm2490_vm2, %v3444_v7  ;;  %2067 = vmatprep.mubr.msk.bf16.mxu1 %vm2490_vm2, %v3444_v7 }
 0x1fc   : > { %2048 = vmatpush3.bf16.msra.mxu0 %v1957_v12  ;;  %v3652_v12 = vld [vmem:[#allocation92_spill] sm:$0xff] }
 0x1fd   : > { %2049 = vmatprep.subr.bf16.mxu0 %v3444_v7  ;;  %v1953_v4 = vcombine.low %v3653_v13, %v3652_v12 }
 0x200   : > { %2050 = vmatpush3.bf16.msra.mxu0 %v1956_v11  ;;  %v3654_v11 = vld [vmem:[#allocation90_spill] sm:$0xff] }
 0x201   : > { %2051 = vmatprep.subr.bf16.mxu0 %v3444_v7  ;;  %v1952_v8 = vcombine.low %v3655_v1, %v3654_v11 }
 0x204   : > { %2052 = vmatpush3.bf16.msra.mxu0 %v1955_v18  ;;  %v3657_v18 = vld [vmem:[#allocation87_spill] sm:$0xff] }
 0x205   : > { %2053 = vmatprep.subr.bf16.mxu0 %v3444_v7  ;;  %v1951_v3 = vcombine.low %v3657_v18, %v3656_v0 }
 0x208   : > { %2054 = vmatpush3.bf16.msra.mxu0 %v1954_v15 }
 0x209   : > { %2055 = vmatprep.subr.bf16.mxu0 %v3444_v7 }
 0x20c   : > { %2056 = vmatpush3.bf16.msra.mxu0 %v1953_v4 }
 0x20d   : > { %2057 = vmatprep.subr.bf16.mxu0 %v3444_v7 }
 0x210   : > { %2058 = vmatpush3.bf16.msra.mxu0 %v1952_v8 }
 0x211   : > { %2059 = vmatprep.subr.bf16.mxu0 %v3444_v7 }
 0x214   : > { %2060 = vmatpush3.bf16.msra.mxu0 %v1951_v3  ;;  %v3191_v3 = vshrl.u32 %v3658_v20, 7 }
 0x215   : > { %2089 = vmatprep.subr.bf16.mxu0 %v3444_v7 }
 0x216   : > { %v1193_v7 = vsub.s32 0, %v3191_v3  ;;  %v1197_v21 = vsub.s32 1, %v3191_v3  ;;  %v1205_v29 = vsub.s32 3, %v3191_v3 }
 0x277   : > { %v653_v5 = vpop.f32.mrf.mxu0  ;;  %v694_v10 = vpop.f32.mrf.mxu1 }
 0x279   : > { %v655_v15 = vpop.f32.mrf.mxu0  ;;  %v696_v12 = vpop.f32.mrf.mxu1 }
 0x27b   : > { %v657_v13 = vpop.f32.mrf.mxu0  ;;  %v698_v4 = vpop.f32.mrf.mxu1 }
 0x27c   : > { %v3659_v13 = vld [vmem:[#allocation86_spill] sm:$0xff] }
 0x27d   : > { %v658_v6 = vpop.f32.mrf.mxu0  ;;  %v699_v9 = vpop.f32.mrf.mxu1  ;;  %v1194_v4 = vrot.slane %v3659_v13, %v1193_v7  ;;  %v1198_v25 = vrot.slane %v3659_v13, %v1197_v21  ;;  %v1206_v21 = vrot.slane %v3659_v13, %v1205_v29 }
 0x297   : > { %v895_v11 = vpop.f32.mrf.mxu0  ;;  %v936_v1 = vpop.f32.mrf.mxu1 }
 0x298   : > { %v896_v22 = vadd.f32 %v895_v11, %v653_v5 }
 0x299   : > { %v897_v14 = vpop.f32.mrf.mxu0  ;;  %v938_v8 = vpop.f32.mrf.mxu1 }
 0x29a   : > { %v898_v23 = vadd.f32 %v897_v14, %v655_v15  ;;  %v939_v11 = vadd.f32 %v938_v8, %v696_v12  ;;  %v1201_v14 = vsub.s32 2, %v3191_v3  ;;  %v937_v15 = vadd.f32 %v936_v1, %v694_v10 }
 0x29b   : > { %v899_v16 = vpop.f32.mrf.mxu0  ;;  %v940_v17 = vpop.f32.mrf.mxu1 }
 0x29d   : > { %v900_v0 = vpop.f32.mrf.mxu0  ;;  %v941_v18 = vpop.f32.mrf.mxu1 }
 0x2b7   : > { %v1138_v6 = vpop.f32.mrf.mxu0  ;;  %v1179_v9 = vpop.f32.mrf.mxu1 }
 0x2b8   : > { %v1186_v24 = vadd.f32 %v1138_v6, %v896_v22 }
 0x2b9   : > { %v1140_v16 = vpop.f32.mrf.mxu0  ;;  %v1181_v17 = vpop.f32.mrf.mxu1 }
 0x2ba   : > { %v1211_v0 = vadd.f32 %v1194_v4, %v1186_v24  ;;  %v1187_v18 = vadd.f32 %v1140_v16, %v898_v23  ;;  %v1189_v22 = vadd.f32 %v1181_v17, %v939_v11  ;;  %v1188_v24 = vadd.f32 %v1179_v9, %v937_v15 }
 0x2bb   : > { %v1142_v26 = vpop.f32.mrf.mxu0  ;;  %v1183_v20 = vpop.f32.mrf.mxu1  ;;  %v1202_v23 = vrot.slane %v3659_v13, %v1201_v14 }
 0x2bc   : > { %v1947_v27 = vmul.f32 -1.442695, %v1211_v0  ;;  %v1212_v28 = vadd.f32 %v1198_v25, %v1187_v18  ;;  %v1214_v26 = vadd.f32 %v1206_v21, %v1189_v22  ;;  %v3660_v20 = vmov 0.0   ;;  %v3661_v22 = vld [vmem:[#allocation103_spill] sm:$0xff] }
 0x2bd   : > { %v1143_v30 = vpop.f32.mrf.mxu0  ;;  %v1184_v5 = vpop.f32.mrf.mxu1  ;;  %v1213_v4 = vadd.f32 %v1202_v23, %v1188_v24 }
 0x2be   : > { %2207 = vpow2.f32 %v1947_v27  ;;  %v1948_v7 = vmul.f32 -1.442695, %v1212_v28  ;;  %v1949_v25 = vmul.f32 -1.442695, %v1214_v26  ;;  %v2491_v5 = vmov 1966171168  }
 0x2c0   : > { %2209 = vpow2.f32 %v1948_v7  ;;  %v1337_v7 = vunpack.c.l.s4 %v2491_v5 }
 0x2c1   : > { %2211 = vtanh.f32 %v1213_v4 }
 0x2c2   : > { %2213 = vpow2.f32 %v1949_v25  ;;  %v1338_v11 = vunpack.c.0.s8 %v1337_v7 }
 0x2c4   : > { %v1341_v15 = vsub.s32 %v1338_v11, %v3191_v3  ;;  %v3662_v3 = vld [vmem:[#allocation137_spill] sm:$0xff] }
 0x2cb   : > { %v2208_v6 = vpop.eup %2207 }
 0x2cc   : > { %v1218_v16 = vadd.f32 1.0, %v2208_v6 }
 0x2cd   : > { %v2210_v30 = vpop.eup %2209 }
 0x2ce   : > { %2215 = vrcp.f32 %v1218_v16  ;;  %v1224_v27 = vadd.f32 1.0, %v2210_v30  ;;  %v2212_v28 = vpop.eup %2211 }
 0x2cf   : > { %v2214_v12 = vpop.eup %2213 }
 0x2d0   : > { %2217 = vrcp.f32 %v1224_v27  ;;  %v1231_v10 = vadd.f32 1.0, %v2214_v12 }
 0x2d2   : > { %2219 = vrcp.f32 %v1231_v10 }
 0x2db   : > { %v2216_v8 = vpop.eup %2215 }
 0x2dc   : > { %v1235_v17 = vmul.f32 %v2216_v8, %v2212_v28 }
 0x2dd   : > { %v2218_v29 = vpop.eup %2217 }
 0x2de   : > { %v1234_v1 = vmul.f32 %v2463_v2, %v2218_v29 }
 0x2df   : > { %v2220_v9 = vpop.eup %2219 }
 0x2e0   : > { %v3202_v2 = vadd.f32 %v1235_v17, %v1234_v1  }
 0x2e2   : > { %2221 = vtanh.f32 %v3202_v2 }
 0x2ef   : > { %v2222_v0 = vpop.eup %2221 }
 0x2f0   : > { %v3205_v10 = vmul.f32 %v2222_v0, %v2220_v9  }
 0x2f2   : > { %v3209_v18 = vpack.c.bf16 %v3205_v10, %v3205_v10 }
 0x2f4   : > { %2062 = vmatmul.mubr.bf16.vlgmr.msra.gmra.mxu0 %v3209_v18 }
 0x2f5   : > { %2105 = vmatprep.mubr.msk.bf16.mxu0 %vm2490_vm2, %v3660_v20 }
 0x3b4   : > { %v1328_v14 = vpop.f32.mrf.mxu0 }
 0x3b5   : > { %v1329_v21 = vadd.f32 %v3661_v22, %v1328_v14 }
 0x3b6   : > { %v2063_v24 = vpop.f32.mrf.mxu0 }
 0x3b7   : > { %v1334_v23 = vmax.f32 %v1329_v21, 0.0 }
 0x3b8   : > { %v1331_v26 = vpop.f32.mrf.mxu0 }
 0x3b9   : > { %v1342_v4 = vrot.slane %v1334_v23, %v1341_v15 }
 0x3ba   : > { %v2064_v25 = vpop.f32.mrf.mxu0 }
 0x3bb   : > { %v1350_v6 = vrot.slane %v1342_v4, %v1341_v15  ;;  %v1343_v16 = vcombine.high %v1342_v4, %v1342_v4 }
 0x3bd   : > { %v1360_v30 = vpack.c.bf16 %v1350_v6, %v1350_v6  ;;  %v1357_v27 = vrot.slane %v1343_v16, %v1341_v15 }
 0x3bf   : > { %2068 = vmatmul.mubr.bf16.vlgmr.msra.gmra.mxu1 %v1360_v30  ;;  %v1361_v28 = vpack.c.bf16 %v1357_v27, %v1357_v27  ;;  %v3663_v27 = vld [vmem:[#allocation135_spill] sm:$0xff] }
 0x3c0   : > { %2072 = vmatpush3.bf16.xpose.msra.mxu1 %v2921_v19  ;;  %2073 = vmatprep.mubr.msk.bf16.mxu1 %vm2490_vm2, %v3660_v20 }
 0x3c1   : > { %2077 = vmatprep.subr.bf16.mxu1 %v3660_v20 }
 0x3c7   : > { %2074 = vmatmul.mubr.bf16.vlgmr.msra.gmra.mxu1 %v1361_v28  ;;  %v3664_v28 = vld [vmem:[#allocation134_spill] sm:$0xff] }
 0x3c8   : > { %2078 = vmatpush3.bf16.msra.mxu1 %v3662_v3  ;;  %2079 = vmatprep.mubr.msk.bf16.mxu1 %vm2490_vm2, %v3660_v20  ;;  %v1968_v3 = vcombine.low %v3664_v28, %v3663_v27  ;;  %v3674_v27 = vld [vmem:[#allocation117_spill] sm:$0xff] }
 0x3c9   : > { %2083 = vmatprep.subr.bf16.mxu1 %v3660_v20 }
 0x3ca   : > { %2090 = vmatpush3.bf16.msra.mxu0 %v1968_v3  ;;  %v3676_v3 = vld [vmem:[#allocation115_spill] sm:$0xff] }
 0x3cb   : > { %2091 = vmatprep.subr.bf16.mxu0 %v3660_v20 }
 0x47f   : > { %v1396_v12 = vpop.f32.mrf.mxu1 }
 0x481   : > { %v2069_v8 = vpop.f32.mrf.mxu1 }
 0x482   : > { %v3665_v8 = vld [vmem:[#allocation133_spill] sm:$0xff] }
 0x483   : > { %v1399_v17 = vpop.f32.mrf.mxu1 }
 0x484   : > { %v3666_v17 = vld [vmem:[#allocation132_spill] sm:$0xff] }
 0x485   : > { %v2070_v29 = vpop.f32.mrf.mxu1 }
 0x486   : > { %v3667_v29 = vld [vmem:[#allocation131_spill] sm:$0xff] }
 0x487   : > { %v1436_v1 = vpop.f32.mrf.mxu1 }
 0x488   : > { %v1444_v9 = vrot.slane %v1436_v1, 7 }
 0x489   : > { %v2075_v0 = vpop.f32.mrf.mxu1 }
 0x48a   : > { %v1445_v5 = vsel %vm455_vm1, %v1444_v9, %v1396_v12  ;;  %v3669_v0 = vld [vmem:[#allocation129_spill] sm:$0xff] }
 0x48b   : > { %v1439_v7 = vpop.f32.mrf.mxu1  ;;  %v1448_v11 = vsel %vm1447_vm3, %v1445_v5, -inf  ;;  %v3670_v5 = vld [vmem:[#allocation128_spill] sm:$0xff] }
 0x48c   : > { %1449 = vmax.xlane.f32.xlu0 %v1448_v11  ;;  %v1965_v7 = vcombine.low %v3670_v5, %v3669_v0  ;;  %v3682_v5 = vld [vmem:[#allocation109_spill] sm:$0xff] }
 0x48d   : > { %v2076_v14 = vpop.f32.mrf.mxu1 }
 0x515   : > { %v1450_v22 = vpop.xlane.xlu0 %1449 }
 0x516   : > { %v1452_v21 = vrot.slane %v1450_v22, 1  ;;  %v1455_v15 = vsub.f32 %v1396_v12, %v1450_v22  ;;  %v1967_v12 = vcombine.low %v3666_v17, %v3665_v8  ;;  %v3677_v8 = vld [vmem:[#allocation114_spill] sm:$0xff] }
 0x517   : > { %v1974_v17 = vcombine.low %v3677_v8, %v3676_v3  ;;  %v3693_v3 = vld [vmem:[#allocation122_spill] sm:$0xff] }
 0x518   : > { %v1456_v24 = vsub.f32 %v1436_v1, %v1452_v21  ;;  %v1457_v23 = vmul.f32 1.442695, %v1455_v15  ;;  %2092 = vmatpush3.bf16.msra.mxu0 %v1967_v12  ;;  %v3668_v1 = vld [vmem:[#allocation130_spill] sm:$0xff]  ;;  %v3679_v12 = vld [vmem:[#allocation112_spill] sm:$0xff] }
 0x519   : > { %v1966_v9 = vcombine.low %v3668_v1, %v3667_v29  ;;  %2093 = vmatprep.subr.bf16.mxu0 %v3660_v20  ;;  %v3680_v1 = vld [vmem:[#allocation111_spill] sm:$0xff] }
 0x51a   : > { %v1459_v26 = vmul.f32 1.442695, %v1456_v24  ;;  %v3671_v24 = vld [vmem:[#allocation138_spill] sm:$0xff] }
 0x51c   : > { %2223 = vpow2.f32 %v1459_v26  ;;  %2094 = vmatpush3.bf16.msra.mxu0 %v1966_v9  ;;  %v3672_v26 = vld [vmem:[#allocation119_spill] sm:$0xff]  ;;  %v3681_v9 = vld [vmem:[#allocation110_spill] sm:$0xff] }
 0x51d   : > { %2225 = vpow2.f32 %v1457_v23  ;;  %2095 = vmatprep.subr.bf16.mxu0 %v3660_v20  ;;  %v1972_v0 = vcombine.low %v3681_v9, %v3680_v1 }
 0x520   : > { %2096 = vmatpush3.bf16.msra.mxu0 %v1965_v7  ;;  %v3683_v7 = vld [vmem:[#allocation108_spill] sm:$0xff] }
 0x521   : > { %2097 = vmatprep.subr.bf16.mxu0 %v3660_v20 }
 0x529   : > { %v2224_v4 = vpop.eup %2223 }
 0x52a   : > { %v1463_v25 = vrot.slane %v2224_v4, 7  ;;  %v2226_v6 = vpop.eup %2225 }
 0x52c   : > { %v1464_v16 = vsel %vm455_vm1, %v1463_v25, %v2226_v6  ;;  %v3673_v25 = vld [vmem:[#allocation118_spill] sm:$0xff] }
 0x52d   : > { %v1466_v30 = vsel %vm1447_vm3, %v1464_v16, 0.0  ;;  %v1976_v16 = vcombine.low %v3673_v25, %v3672_v26  ;;  %v3688_v26 = vld [vmem:[#allocation127_spill] sm:$0xff]  ;;  %v3689_v25 = vld [vmem:[#allocation126_spill] sm:$0xff] }
 0x52e   : > { %1467 = vadd.xlane.f32.xlu0 %v1466_v30 }
 0x5b7   : > { %v1468_v11 = vpop.xlane.xlu0 %1467 }
 0x5b8   : > { %2227 = vrcp.f32 %v1468_v11  ;;  %v1971_v11 = vcombine.low %v3683_v7, %v3682_v5 }
 0x5c5   : > { %v2228_v14 = vpop.eup %2227 }
 0x5c6   : > { %v1474_v22 = vmul.f32 %v2228_v14, %v2226_v6  ;;  %v1471_v15 = vrot.slane %v2228_v14, 1  ;;  %v3675_v6 = vld [vmem:[#allocation116_spill] sm:$0xff]  ;;  %v3684_v14 = vld [vmem:[#allocation107_spill] sm:$0xff] }
 0x5c7   : > { %v1975_v28 = vcombine.low %v3675_v6, %v3674_v27  ;;  %v3691_v27 = vld [vmem:[#allocation124_spill] sm:$0xff] }
 0x5c8   : > { %v1476_v21 = vpack.c.bf16 %v1474_v22, %v1474_v22  ;;  %v1475_v23 = vmul.f32 %v2224_v4, %v1471_v15  ;;  %v3678_v4 = vld [vmem:[#allocation113_spill] sm:$0xff]  ;;  %v3685_v22 = vld [vmem:[#allocation106_spill] sm:$0xff] }
 0x5c9   : > { %v1973_v29 = vcombine.low %v3679_v12, %v3678_v4  ;;  %v3686_v15 = vld [vmem:[#allocation105_spill] sm:$0xff] }
 0x5ca   : > { %2080 = vmatmul.mubr.msk.bf16.vlgmr.msra.gmra.mxu1 %vm1478_vm4, %v1476_v21  ;;  %v1477_v30 = vpack.c.bf16 %v1475_v23, %v1475_v23  ;;  %v1970_v21 = vcombine.low %v3685_v22, %v3684_v14 }
 0x5cb   : > { %2084 = vmatpush3.bf16.msra.mxu1 %v3671_v24  ;;  %2085 = vmatprep.mubr.msk.bf16.mxu1 %vm2490_vm2, %v3660_v20  ;;  %v3687_v24 = vld [vmem:[#allocation104_spill] sm:$0xff] }
 0x5cc   : > { %2109 = vmatprep.subr.bf16.mxu1 %v3660_v20  ;;  %v1969_v23 = vcombine.low %v3687_v24, %v3686_v15 }
 0x5d2   : > { %2086 = vmatmul.mubr.msk.bf16.vlgmr.msra.gmra.mxu1 %vm1478_vm4, %v1477_v30  ;;  %v3690_v30 = vld [vmem:[#allocation125_spill] sm:$0xff] }
 0x5d3   : > { %2110 = vmatpush3.bf16.msra.mxu1 %v1976_v16  ;;  %2125 = vmatprep.mubr.msk.bf16.mxu1 %vm2490_vm2, %v3660_v20  ;;  %v1964_v16 = vcombine.low %v3689_v25, %v3688_v26  ;;  %v1963_v6 = vcombine.low %v3691_v27, %v3690_v30 }
 0x5d4   : > { %2111 = vmatprep.subr.bf16.mxu1 %v3660_v20 }
 0x5d5   : > { %2098 = vmatpush3.bf16.msra.mxu0 %v1964_v16 }
 0x5d6   : > { %2099 = vmatprep.subr.bf16.mxu0 %v3660_v20 }
 0x5d7   : > { %2112 = vmatpush3.bf16.msra.mxu1 %v1975_v28  ;;  %v3692_v28 = vld [vmem:[#allocation123_spill] sm:$0xff] }
 0x5d8   : > { %2113 = vmatprep.subr.bf16.mxu1 %v3660_v20  ;;  %v1962_v8 = vcombine.low %v3693_v3, %v3692_v28  ;;  %v3696_v3 = vld [vmem:[#allocation136_spill] sm:$0xff] }
 0x5d9   : > { %2100 = vmatpush3.bf16.msra.mxu0 %v1963_v6 }
 0x5da   : > { %2101 = vmatprep.subr.bf16.mxu0 %v3660_v20 }
 0x5db   : > { %2114 = vmatpush3.bf16.msra.mxu1 %v1974_v17  ;;  %v3694_v17 = vld [vmem:[#allocation121_spill] sm:$0xff] }
 0x5dc   : > { %2115 = vmatprep.subr.bf16.mxu1 %v3660_v20 }
 0x5dd   : > { %2102 = vmatpush3.bf16.msra.mxu0 %v1962_v8 }
 0x5de   : > { %2103 = vmatprep.subr.bf16.mxu0 %v3660_v20 }
 0x5df   : > { %2116 = vmatpush3.bf16.msra.mxu1 %v1973_v29 }
 0x5e0   : > { %2117 = vmatprep.subr.bf16.mxu1 %v3660_v20 }
 0x5e3   : > { %2118 = vmatpush3.bf16.msra.mxu1 %v1972_v0 }
 0x5e4   : > { %2119 = vmatprep.subr.bf16.mxu1 %v3660_v20 }
 0x5e7   : > { %2120 = vmatpush3.bf16.msra.mxu1 %v1971_v11 }
 0x5e8   : > { %2121 = vmatprep.subr.bf16.mxu1 %v3660_v20 }
 0x5eb   : > { %2122 = vmatpush3.bf16.msra.mxu1 %v1970_v21 }
 0x5ec   : > { %2123 = vmatprep.subr.bf16.mxu1 %v3660_v20 }
 0x5ef   : > { %2124 = vmatpush3.bf16.msra.mxu1 %v1969_v23 }
 0x5f2   : > { %2126 = vmatmul.mubr.bf16.vlgmr.msra.gmra.mxu1 %v3209_v18  ;;  %v3695_v18 = vld [vmem:[#allocation120_spill] sm:$0xff] }
 0x5f3   : > { %v1961_v4 = vcombine.low %v3695_v18, %v3694_v17 }
 0x5f5   : > { %2104 = vmatpush3.bf16.msra.mxu0 %v1961_v4 }
 0x68a   : > { %v3281_v8 = vpop.f32.mrf.mxu1  }
 0x68b   : > { %v1565_v9 = vpack.c.bf16 %v3281_v8, %v3281_v8 }
 0x68c   : > { %v2081_v12 = vpop.f32.mrf.mxu1 }
 0x68d   : > { %v1569_v22 = vunpack.c.l.b16 %v1565_v9 }
 0x68e   : > { %v1519_v29 = vpop.f32.mrf.mxu1 }
 0x690   : > { %v2082_v1 = vpop.f32.mrf.mxu1 }
 0x692   : > { %v3283_v7 = vpop.f32.mrf.mxu1  }
 0x693   : > { %v1566_v0 = vpack.c.bf16 %v3283_v7, %v3283_v7 }
 0x694   : > { %v2087_v5 = vpop.f32.mrf.mxu1 }
 0x695   : > { %v1570_v11 = vunpack.c.l.b16 %v1566_v0 }
 0x696   : > { %v1562_v14 = vpop.f32.mrf.mxu1 }
 0x697   : > { %v1571_v21 = vrot.slane %v1570_v11, 7 }
 0x698   : > { %v2088_v15 = vpop.f32.mrf.mxu1 }
 0x699   : > { %v1572_v24 = vsel %vm455_vm1, %v1571_v21, %v1569_v22 }
 0x69a   : > { %v1573_v23 = vpack.c.b16 %v1572_v24, %v1572_v24 }
 0x69c   : > { %2106 = vmatmul.mubr.bf16.vlgmr.msra.gmra.mxu0 %v1573_v23 }
 0x6b2   : > { %v1745_v26 = vpop.f32.mrf.mxu1 }
 0x6b4   : > { %v2127_v25 = vpop.f32.mrf.mxu1 }
 0x6b6   : > { %v1748_v16 = vpop.f32.mrf.mxu1 }
 0x6b8   : > { %v2128_v30 = vpop.f32.mrf.mxu1 }
 0x75c   : > { %v1657_v27 = vpop.f32.mrf.mxu0 }
 0x75d   : > { %v1746_v6 = vadd.f32 %v1745_v26, %v1657_v27  ;;  %v3697_v26 = vld [vmem:[#allocation139_spill] sm:$0xff] }
 0x75e   : > { %v2107_v28 = vpop.f32.mrf.mxu0 }
 0x75f   : > { %v1757_v17 = vadd.f32 %v3696_v3, %v1746_v6 }
 0x760   : > { %v1660_v18 = vpop.f32.mrf.mxu0 }
 0x761   : > { %v1759_v4 = vsel %vm1758_vm5, %v1757_v17, -inf }
 0x762   : > { %1760 = vmax.xlane.f32.xlu1 %v1759_v4  ;;  %v2108_v12 = vpop.f32.mrf.mxu0 }
 0x7eb   : > { %v1761_v29 = vpop.xlane.xlu1 %1760 }
 0x7ec   : > { %v1762_v1 = vsub.f32 %v1757_v17, %v1761_v29 }
 0x7ee   : > { %v1763_v9 = vmul.f32 1.442695, %v1762_v1 }
 0x7f0   : > { %2229 = vpow2.f32 %v1763_v9 }
 0x7fd   : > { %v2230_v0 = vpop.eup %2229 }
 0x7fe   : > { %v1765_v5 = vsel %vm1758_vm5, %v2230_v0, 0.0 }
 0x7ff   : > { %1766 = vadd.xlane.f32.xlu1 %v1765_v5 }
 0x888   : > { %v1767_v11 = vpop.xlane.xlu1 %1766 }
 0x889   : > { %2231 = vlog2.f32 %v1767_v11 }
 0x896   : > { %v2232_v14 = vpop.eup %2231 }
 0x897   : > { %v1769_v22 = vmul.f32 0.6931472, %v2232_v14 }
 0x899   : > { %v1770_v21 = vadd.f32 %v1769_v22, %v1761_v29 }
 0x89b   : > { %v1771_v15 = vsub.f32 %v1757_v17, %v1770_v21 }
 0x89d   : > { %v1775_v24 = vsel %vm1758_vm5, %v1771_v15, -inf  ;;  %1774 = vst [vmem:[%s1773_s29] sm:$0x3] %v1771_v15 }
 0x89e   : > { %1776 = vmax.xlane.f32.xlu0 %v1775_v24 }
 0x927   : > { %v1777_v23 = vpop.xlane.xlu0 %1776 }
 0x928   : > { %vm1778_vm6 = vcmp.eq.f32.partialorder %v1771_v15, %v1777_v23 }
 0x929   : > { %v1779_v25 = vsel %vm1778_vm6, %v3697_v26, 128 }
 0x92a   : > { %v1780_v16 = vsel %vm1758_vm5, %v1779_v25, 2147483647 }
 0x92b   : > { %v1782_v30 = vshra.s32 %v1780_v16, 16  ;;  %v1781_v6 = vand.u32 65535, %v1780_v16 }
 0x92d   : > { %v1784_v27 = vcvt.s32.f32 %v1782_v30  ;;  %v1783_v3 = vcvt.s32.f32 %v1781_v6 }
 0x92f   : > { %1785 = vmin.xlane.f32.xlu1 %v1784_v27 }
 0x9b8   : > { %v1786_v28 = vpop.xlane.xlu1 %1785 }
 0x9b9   : > { %vm1787_vm7 = vcmp.eq.f32.partialorder %v1784_v27, %v1786_v28  ;;  %v1792_v17 = vcvt.f32.s32 %v1786_v28 }
 0x9ba   : > { %v1788_v18 = vsel %vm1787_vm7, %v1783_v3, inf }
 0x9bb   : > { %1789 = vmin.xlane.f32.xlu0 %v1788_v18  ;;  %v1793_v12 = vshll.u32 %v1792_v17, 16 }
 0xa44   : > { %v1790_v4 = vpop.xlane.xlu0 %1789 }
 0xa45   : > { %v1791_v29 = vcvt.f32.s32 %v1790_v4 }
 0xa46   :  { %440 = sbr.rel (!%p438_p12) target bundleno = 405 (0x195), region = 108 }
 0xa47   : > { %v1794_v1 = vadd.s32 %v1793_v12, %v1791_v29 }
 0xa49   : > { %vm1795_vm8 = vcmp.eq.s32.totalorder %v3697_v26, %v1794_v1 }
 0xa4a   : > { %v1979_v1 = vsel %vm1795_vm8, 1.0, %v3660_v20  }
 0xa4b   :  { %2404 = shalt.err (!%p2401_p3)
}
 0xa4c   :  { %s2493_s7 = smov 32   ;;  %s2494_s15 = smov 2  }
 0xa4d   :  { %1809 = dma.vmem_to_hbm [thread:$0]  %s1804_s13, 256, %s3331_s12, [#allocation4], %s2493_s7, %s2493_s7, %s2494_s15  }
 0xa4e   :  { %2447 = dma.done.wait [#allocation4], 256  }
 0xa4f   :  { %2448 = vsyncadd [#allocation4], 4294967040 }
 0xa50   :  { %1813 = vsyncpa [#allocation3], 1 }
 0xa51   :  { %1814 = vsyncpa [#allocation6], 1 }
 0xa52   :  { %1815 = vsyncpa [#allocation9], 1 }
 0xa53   :  { %1816 = vsyncpa [#allocation12], 1 }
 0xa54   :  { %1817 = vsyncpa [#allocation15], 1 }
 0xa55   :  { %1818 = vsyncpa [#allocation4], 1 }

</bundles_post_ra>
